<compile_context>
chip_gen: v7x
topology: tpu7x:2x2x1
jax: 0.10.0
libtpu: 0.0.40
codegen_flags: <defaults>
</compile_context>

<pallas_src>
import functools
import math

import jax
import jax.numpy as jnp
from jax import lax
from jax.experimental import pallas as pl
from jax.experimental.pallas import tpu as pltpu


# ----------------------------------------------------------------------------
# Fused kernel: all encoder layers + conv/mslinear head for one batch group.
# ----------------------------------------------------------------------------
def _fused_kernel(x_ref,      # (G, L, E)  f32   embedded input
                  kmask_ref,  # (G, 1, L)  f32   additive key-padding mask
                  omask_ref,  # (G, L, 1)  f32   output keep-mask (0/1)
                  wqkv_ref,   # (num_layers, E, 3E) bf16  fused [Wq|Wk|Wv]
                  bqkv_ref,   # (num_layers, 1, 3E) f32
                  wo_ref,     # (num_layers, E, E)  bf16  output projection
                  vecs_ref,   # (num_layers, 6, E)  f32  [bo,ln1w,ln1b,b2,ln2w,ln2b]
                  w1_ref,     # (num_layers, E, F)  bf16
                  b1_ref,     # (num_layers, 1, F)  f32
                  w2_ref,     # (num_layers, F, E)  bf16
                  convw_ref,  # (2, E, E) bf16
                  convb_ref,  # (1, E)    f32
                  msw_ref,    # (E, NCP)  bf16  (mslinear, lane padded)
                  msb_ref,    # (1, NCP)  f32
                  out_ref,    # (G, L, NCP) bf16
                  xs_ref,     # scratch (G*L, E) f32 -- resident activations
                  *, nhead):
    G, L, E = x_ref.shape
    M = G * L
    dh = E // nhead
    scale = 1.0 / math.sqrt(dh)
    k = pl.program_id(1)

    @pl.when(k == 0)
    def _load():
        xs_ref[...] = x_ref[...].reshape(M, E)

    x = xs_ref[...]                               # (M, E) f32
    xb = x.astype(jnp.bfloat16)
    add_mask = kmask_ref[...]                     # (G, 1, L) f32

    vecs = vecs_ref[k]                            # (6, E) f32
    bo, ln1w, ln1b = vecs[0:1], vecs[1:2], vecs[2:3]
    b2, ln2w, ln2b = vecs[3:4], vecs[4:5], vecs[5:6]

    # ---- multi-head self-attention: single fused QKV matmul, per-head score /
    #      PV einsums batched over the group, single fused output projection ----
    qkv = jnp.dot(xb, wqkv_ref[k],
                  preferred_element_type=jnp.float32) + bqkv_ref[k]     # (M, 3E)
    # TODO(synk): optionally batch the score/PV einsums across heads as well
    # (stack heads into the batch axis) to shrink the unrolled MXU stream.
    heads = []
    for h in range(nhead):
        qh = qkv[:, h * dh:(h + 1) * dh]
        kh = qkv[:, E + h * dh:E + (h + 1) * dh]
        vh = qkv[:, 2 * E + h * dh:2 * E + (h + 1) * dh]
        q3 = qh.reshape(G, L, dh).astype(jnp.bfloat16)
        k3 = kh.reshape(G, L, dh).astype(jnp.bfloat16)
        v3 = vh.reshape(G, L, dh).astype(jnp.bfloat16)
        s = jnp.einsum('gqd,gkd->gqk', q3, k3,
                       preferred_element_type=jnp.float32) * scale + add_mask
        s = s - jnp.max(s, axis=-1, keepdims=True)
        p = jnp.exp(s)
        p = p * pl.reciprocal(jnp.sum(p, axis=-1, keepdims=True), approx=True)
        o3 = jnp.einsum('gqk,gkd->gqd', p.astype(jnp.bfloat16), v3,
                        preferred_element_type=jnp.float32)             # (G, L, dh)
        heads.append(o3.reshape(M, dh))
    attn_cat = jnp.concatenate(heads, axis=-1)                          # (M, E)
    attn = jnp.dot(attn_cat.astype(jnp.bfloat16), wo_ref[k],
                   preferred_element_type=jnp.float32) + bo

    def layer_norm(y, w, b):
        mu = jnp.mean(y, axis=-1, keepdims=True)
        var = jnp.mean(jnp.square(y - mu), axis=-1, keepdims=True)
        return (y - mu) * lax.rsqrt(var + 1e-5) * w + b

    x1 = layer_norm(x + attn, ln1w, ln1b)

    # ---- feed-forward (bf16 matmul inputs, f32 accumulate / elementwise) ----
    h1 = jnp.maximum(
        jnp.dot(x1.astype(jnp.bfloat16), w1_ref[k],
                preferred_element_type=jnp.float32) + b1_ref[k], 0.0)
    h2 = jnp.dot(h1.astype(jnp.bfloat16), w2_ref[k],
                 preferred_element_type=jnp.float32) + b2
    x2 = layer_norm(x1 + h2, ln2w, ln2b)
    xs_ref[...] = x2

    # ---- conv(k=2) + ReLU + mslinear + ReLU + seq-len mask (last layer only),
    #      lane-dense (128-padded) bf16 output store ----
    @pl.when(k == pl.num_programs(1) - 1)
    def _head():
        xb2 = x2.astype(jnp.bfloat16)
        # x[t+1] via a sublane roll (XLU slot, O(M)).  shift = M-1 == -1 mod M.
        # Wrap rows (last position of each group element / last row overall)
        # are always zeroed by the keep-mask since t < len-1 <= L-1.
        xnext = pltpu.roll(x2, shift=M - 1, axis=0).astype(jnp.bfloat16)
        y = (jnp.dot(xb2, convw_ref[0], preferred_element_type=jnp.float32)
             + jnp.dot(xnext, convw_ref[1], preferred_element_type=jnp.float32)
             + convb_ref[...])
        y = jnp.maximum(y, 0.0)
        z = jnp.dot(y.astype(jnp.bfloat16), msw_ref[...],
                    preferred_element_type=jnp.float32) + msb_ref[...]
        z = jnp.maximum(z, 0.0)                                         # (M, NCP)
        ncp = z.shape[-1]
        out_ref[...] = (z.reshape(G, L, ncp) * omask_ref[...]).astype(out_ref.dtype)


# ----------------------------------------------------------------------------
# Wrapper around the fused pallas_call
# ----------------------------------------------------------------------------
def fused_transformer_head(x, lengths, pk, *, nhead, rows_per_step=512):
    N, L, E = x.shape
    num_layers, _, F = pk['w1'].shape
    ncp = pk['msw'].shape[1]

    # batch grouping: each grid step sees G batch elements = G*L rows so the MXU
    # works on large-M tiles.
    if L % 8 == 0:
        g_cap = max(1, rows_per_step // L)
    else:
        g_cap = 1  # TODO(synk): pad L to a multiple of 8 upstream for layout-free reshapes
    try:
        kind = jax.devices()[0].device_kind.lower()
    except Exception:
        kind = ""
    two_tc = any(t in kind for t in ("v4", "v5p", "v7"))
    if two_tc:
        # keep >= 2 batch groups so both TensorCores get work on the parallel axis
        g_cap = min(g_cap, max(1, N // 2))
    G = max(d for d in range(1, N + 1) if N % d == 0 and d <= g_cap)
    NB = N // G
    M = G * L

    # masks built once in the wrapper with a single vector compare each
    lens = lengths.astype(jnp.int32)
    pos = jnp.arange(L, dtype=jnp.int32)
    kmask = jnp.where(pos[None, None, :] >= lens[:, None, None],
                      jnp.float32(-1e30), jnp.float32(0.0))          # (N, 1, L)
    omask = (pos[None, :, None] < (lens[:, None, None] - 1)
             ).astype(jnp.float32)                                   # (N, L, 1)

    out = pl.pallas_call(
        functools.partial(_fused_kernel, nhead=nhead),
        out_shape=jax.ShapeDtypeStruct((N, L, ncp), jnp.bfloat16),
        grid_spec=pltpu.PrefetchScalarGridSpec(
            num_scalar_prefetch=0,
            grid=(NB, num_layers),
            in_specs=[
                pl.BlockSpec((G, L, E), lambda i, k: (i, 0, 0)),
                pl.BlockSpec((G, 1, L), lambda i, k: (i, 0, 0)),
                pl.BlockSpec((G, L, 1), lambda i, k: (i, 0, 0)),
                # weight stacks: constant block index -> loaded once, resident
                pl.BlockSpec((num_layers, E, 3 * E), lambda i, k: (0, 0, 0)),
                pl.BlockSpec((num_layers, 1, 3 * E), lambda i, k: (0, 0, 0)),
                pl.BlockSpec((num_layers, E, E), lambda i, k: (0, 0, 0)),
                pl.BlockSpec((num_layers, 6, E), lambda i, k: (0, 0, 0)),
                pl.BlockSpec((num_layers, E, F), lambda i, k: (0, 0, 0)),
                pl.BlockSpec((num_layers, 1, F), lambda i, k: (0, 0, 0)),
                pl.BlockSpec((num_layers, F, E), lambda i, k: (0, 0, 0)),
                pl.BlockSpec((2, E, E), lambda i, k: (0, 0, 0)),
                pl.BlockSpec((1, E), lambda i, k: (0, 0)),
                pl.BlockSpec((E, ncp), lambda i, k: (0, 0)),
                pl.BlockSpec((1, ncp), lambda i, k: (0, 0)),
            ],
            out_specs=pl.BlockSpec((G, L, ncp), lambda i, k: (i, 0, 0)),
            scratch_shapes=[pltpu.VMEM((M, E), jnp.float32)],
        ),
        compiler_params=pltpu.CompilerParams(
            dimension_semantics=("parallel", "arbitrary"),
            vmem_limit_bytes=32 * 1024 * 1024,
        ),
    )(x, kmask, omask,
      pk['wqkv'], pk['bqkv'], pk['wo'], pk['vecs'],
      pk['w1'], pk['b1'], pk['w2'],
      pk['convw'], pk['convb'], pk['msw'], pk['msb'])
    return out


# ----------------------------------------------------------------------------
# Parameter packing (one-time JAX glue): fused QKV, stacked layer axis,
# packed bias/LN vectors, bf16 matmul inputs, lane-padded mslinear.
# ----------------------------------------------------------------------------
def pack_params(p, ncol_pad):
    E = p['a_emb'].shape[1]
    num_col = p['ms_w'].shape[1]

    wqkv, bqkv, wo, vecs, w1, b1, w2 = [], [], [], [], [], [], []
    for lp in p['layers']:
        wqkv.append(jnp.concatenate([lp['wq'], lp['wk'], lp['wv']], axis=1))  # (E, 3E)
        bqkv.append(jnp.concatenate([lp['bq'], lp['bk'], lp['bv']], axis=1))  # (1, 3E)
        wo.append(lp['wo'])
        vecs.append(jnp.concatenate(
            [lp['bo'], lp['ln1w'], lp['ln1b'], lp['b2'], lp['ln2w'], lp['ln2b']], axis=0))
        w1.append(lp['w1']); b1.append(lp['b1']); w2.append(lp['w2'])

    msw = jnp.zeros((E, ncol_pad), jnp.float32).at[:, :num_col].set(p['ms_w'])
    msb = jnp.zeros((1, ncol_pad), jnp.float32).at[:, :num_col].set(p['ms_b'])
    return {
        'wqkv': jnp.stack(wqkv).astype(jnp.bfloat16),
        'bqkv': jnp.stack(bqkv).astype(jnp.float32),
        'wo': jnp.stack(wo).astype(jnp.bfloat16),
        'vecs': jnp.stack(vecs).astype(jnp.float32),
        'w1': jnp.stack(w1).astype(jnp.bfloat16),
        'b1': jnp.stack(b1).astype(jnp.float32),
        'w2': jnp.stack(w2).astype(jnp.bfloat16),
        'convw': jnp.stack([p['conv_w0'], p['conv_w1']]).astype(jnp.bfloat16),
        'convb': p['conv_b'].astype(jnp.float32),
        'msw': msw.astype(jnp.bfloat16),
        'msb': msb,
    }


# ----------------------------------------------------------------------------
# Parameters (deterministic, kernel layout i.e. already transposed vs PyTorch)
# ----------------------------------------------------------------------------
def init_params(key, maxlength, acid_size, embed_dim, nhead, num_layers,
                dim_feedforward, num_col):
    keys = iter(jax.random.split(key, 128))

    def nrm(shape, scale=0.05):
        return jax.random.normal(next(keys), shape, jnp.float32) * scale

    p = {
        'a_emb': nrm((acid_size, embed_dim)).at[0].set(0.0),    # padding_idx=0
        'pos_emb': nrm((maxlength, embed_dim)),
        'charge_emb': nrm((10, embed_dim)).at[0].set(0.0),      # padding_idx=0
        'phos_emb': nrm((4, embed_dim)),
        'layers': [],
        'conv_w0': nrm((embed_dim, embed_dim)),     # conv.weight[:, :, 0].T
        'conv_w1': nrm((embed_dim, embed_dim)),     # conv.weight[:, :, 1].T
        'conv_b': nrm((1, embed_dim)),
        'ms_w': nrm((embed_dim, num_col)),          # mslinear.weight.T
        'ms_b': nrm((1, num_col)),
    }
    for _ in range(num_layers):
        p['layers'].append({
            'wq': nrm((embed_dim, embed_dim)), 'bq': nrm((1, embed_dim)),
            'wk': nrm((embed_dim, embed_dim)), 'bk': nrm((1, embed_dim)),
            'wv': nrm((embed_dim, embed_dim)), 'bv': nrm((1, embed_dim)),
            'wo': nrm((embed_dim, embed_dim)), 'bo': nrm((1, embed_dim)),
            'ln1w': jnp.ones((1, embed_dim), jnp.float32),
            'ln1b': jnp.zeros((1, embed_dim), jnp.float32),
            'w1': nrm((embed_dim, dim_feedforward)), 'b1': nrm((1, dim_feedforward)),
            'w2': nrm((dim_feedforward, embed_dim)), 'b2': nrm((1, embed_dim)),
            'ln2w': jnp.ones((1, embed_dim), jnp.float32),
            'ln2b': jnp.zeros((1, embed_dim), jnp.float32),
        })
    return p


# ----------------------------------------------------------------------------
# Full forward (embedding gathers are plain-JAX glue; hot path is Pallas)
# ----------------------------------------------------------------------------
def model_forward(params, peptide_tokens, peptide_length, charge, decoration,
                  *, nhead, num_col):
    N, L = peptide_tokens.shape
    x = (params['a_emb'][peptide_tokens]
         + params['pos_emb'][jnp.arange(L)][None, :, :]
         + params['phos_emb'][decoration]
         + params['charge_emb'][charge][:, None, :]).astype(jnp.float32)

    ncol_pad = max(128, ((num_col + 127) // 128) * 128)
    pk = pack_params(params, ncol_pad)
    out = fused_transformer_head(x, peptide_length, pk, nhead=nhead)
    pred = out[:, :L - 1, :num_col].astype(jnp.float32).reshape(N, (L - 1) * num_col)
    return {'pred': pred, 'sequence': peptide_tokens, 'charge': charge,
            'decoration': decoration, 'seq_len': peptide_length}


# ----------------------------------------------------------------------------
# Pure-JAX reference (same math / same canonical params) for a sanity check
# ----------------------------------------------------------------------------
def ref_forward(p, tokens, lengths, charge, decoration, nhead, num_col):
    N, L = tokens.shape
    E = p['a_emb'].shape[1]
    dh = E // nhead

    def layer_norm(y, w, b):
        mu = jnp.mean(y, axis=-1, keepdims=True)
        var = jnp.mean((y - mu) ** 2, axis=-1, keepdims=True)
        return (y - mu) * lax.rsqrt(var + 1e-5) * w + b

    x = (p['a_emb'][tokens] + p['pos_emb'][jnp.arange(L)][None]
         + p['phos_emb'][decoration] + p['charge_emb'][charge][:, None, :])
    pad = jnp.arange(L)[None, :] >= lengths[:, None]
    add_mask = jnp.where(pad, -1e30, 0.0)[:, None, None, :]   # (N,1,1,L)

    for lp in p['layers']:
        q = x @ lp['wq'] + lp['bq']
        k = x @ lp['wk'] + lp['bk']
        v = x @ lp['wv'] + lp['bv']
        split = lambda t: t.reshape(N, L, nhead, dh).transpose(0, 2, 1, 3)
        qh, kh, vh = split(q), split(k), split(v)
        s = jnp.einsum('nhqd,nhkd->nhqk', qh, kh) / math.sqrt(dh) + add_mask
        a = jax.nn.softmax(s, axis=-1)
        o = jnp.einsum('nhqk,nhkd->nhqd', a, vh).transpose(0, 2, 1, 3).reshape(N, L, E)
        o = o @ lp['wo'] + lp['bo']
        x = layer_norm(x + o, lp['ln1w'], lp['ln1b'])
        h = jax.nn.relu(x @ lp['w1'] + lp['b1']) @ lp['w2'] + lp['b2']
        x = layer_norm(x + h, lp['ln2w'], lp['ln2b'])

    y = jax.nn.relu(x[:, :-1, :] @ p['conv_w0'] + x[:, 1:, :] @ p['conv_w1'] + p['conv_b'])
    z = jax.nn.relu(y @ p['ms_w'] + p['ms_b'])
    keep = jnp.arange(L - 1)[None, :, None] < (lengths[:, None, None] - 1)
    z = jnp.where(keep, z, 0.0)
    return z.reshape(N, -1)


if __name__ == "__main__":
    # small shapes consistent with the module
    MAXLEN, ACID_SIZE, EMBED_DIM, NHEAD, NUM_LAYERS, NUM_COL = 8, 16, 32, 4, 2, 12
    DIM_FEEDFORWARD = 2048   # nn.TransformerEncoderLayer default
    N, L = 2, MAXLEN

    key = jax.random.PRNGKey(0)
    pkey, dkey = jax.random.split(key)
    params = init_params(pkey, MAXLEN, ACID_SIZE, EMBED_DIM, NHEAD, NUM_LAYERS,
                         DIM_FEEDFORWARD, NUM_COL)

    k1, k2 = jax.random.split(dkey)
    peptide_length = jnp.array([L, 5], dtype=jnp.int32)          # max == L
    pos = jnp.arange(L)[None, :]
    peptide_tokens = jax.random.randint(k1, (N, L), 1, ACID_SIZE).astype(jnp.int32)
    peptide_tokens = jnp.where(pos < peptide_length[:, None], peptide_tokens, 0)
    charge = jnp.array([2, 3], dtype=jnp.int32)
    decoration = jax.random.randint(k2, (N, L), 0, 4).astype(jnp.int32)
    decoration = jnp.where(pos < peptide_length[:, None], decoration, 0)

    out = model_forward(params, peptide_tokens, peptide_length, charge, decoration,
                        nhead=NHEAD, num_col=NUM_COL)
    pred = jax.block_until_ready(out['pred'])
    assert pred.shape == (N, (L - 1) * NUM_COL)
    assert bool(jnp.all(jnp.isfinite(pred)))

    ref = ref_forward(params, peptide_tokens, peptide_length, charge, decoration,
                      NHEAD, NUM_COL)
    err = float(jnp.max(jnp.abs(pred - ref)))
    assert err < 5e-2, f"max abs err {err}"
    print("KERNEL_OK")
</pallas_src>

<mosaic_0001>
module attributes {stable_mosaic.version = 11 : i64} {
  func.func @_fused_kernel(%arg0: i32, %arg1: i32, %arg2: memref<2x8x32xf32, #tpu.memory_space<vmem>>, %arg3: memref<2x1x8xf32, #tpu.memory_space<vmem>>, %arg4: memref<2x8x1xf32, #tpu.memory_space<vmem>>, %arg5: memref<2x32x96xbf16, #tpu.memory_space<vmem>>, %arg6: memref<2x1x96xf32, #tpu.memory_space<vmem>>, %arg7: memref<2x32x32xbf16, #tpu.memory_space<vmem>>, %arg8: memref<2x6x32xf32, #tpu.memory_space<vmem>>, %arg9: memref<2x32x2048xbf16, #tpu.memory_space<vmem>>, %arg10: memref<2x1x2048xf32, #tpu.memory_space<vmem>>, %arg11: memref<2x2048x32xbf16, #tpu.memory_space<vmem>>, %arg12: memref<2x32x32xbf16, #tpu.memory_space<vmem>>, %arg13: memref<1x32xf32, #tpu.memory_space<vmem>>, %arg14: memref<32x128xbf16, #tpu.memory_space<vmem>>, %arg15: memref<1x128xf32, #tpu.memory_space<vmem>>, %arg16: memref<2x8x128xbf16, #tpu.memory_space<vmem>>, %arg17: memref<16x32xf32, #tpu.memory_space<vmem>>) attributes {dimension_semantics = [#tpu.dimension_semantics<parallel>, #tpu.dimension_semantics<arbitrary>], iteration_bounds = array<i64: 1, 2>, scalar_prefetch = 0 : i64, scratch_operands = 1 : i64, tpu.core_type = #tpu.core_type<tc>, window_params = [{transform_indices = @transform_0, window_bounds = array<i64: 2, 8, 32>}, {transform_indices = @transform_1, window_bounds = array<i64: 2, 1, 8>}, {transform_indices = @transform_2, window_bounds = array<i64: 2, 8, 1>}, {pipeline_mode = #tpu.pipeline_mode<synchronous>, transform_indices = @transform_3, window_bounds = array<i64: 2, 32, 96>}, {pipeline_mode = #tpu.pipeline_mode<synchronous>, transform_indices = @transform_4, window_bounds = array<i64: 2, 1, 96>}, {pipeline_mode = #tpu.pipeline_mode<synchronous>, transform_indices = @transform_5, window_bounds = array<i64: 2, 32, 32>}, {pipeline_mode = #tpu.pipeline_mode<synchronous>, transform_indices = @transform_6, window_bounds = array<i64: 2, 6, 32>}, {pipeline_mode = #tpu.pipeline_mode<synchronous>, transform_indices = @transform_7, window_bounds = array<i64: 2, 32, 2048>}, {pipeline_mode = #tpu.pipeline_mode<synchronous>, transform_indices = @transform_8, window_bounds = array<i64: 2, 1, 2048>}, {pipeline_mode = #tpu.pipeline_mode<synchronous>, transform_indices = @transform_9, window_bounds = array<i64: 2, 2048, 32>}, {pipeline_mode = #tpu.pipeline_mode<synchronous>, transform_indices = @transform_10, window_bounds = array<i64: 2, 32, 32>}, {pipeline_mode = #tpu.pipeline_mode<synchronous>, transform_indices = @transform_11, window_bounds = array<i64: 1, 32>}, {pipeline_mode = #tpu.pipeline_mode<synchronous>, transform_indices = @transform_12, window_bounds = array<i64: 32, 128>}, {pipeline_mode = #tpu.pipeline_mode<synchronous>, transform_indices = @transform_13, window_bounds = array<i64: 1, 128>}, {transform_indices = @transform_14, window_bounds = array<i64: 2, 8, 128>}]} {
    %c0_i32 = arith.constant 0 : i32
    %0 = arith.cmpi eq, %arg1, %c0_i32 : i32
    %1 = arith.extui %0 : i1 to i32
    %c0_i32_0 = arith.constant 0 : i32
    %2 = arith.cmpi ne, %1, %c0_i32_0 : i32
    scf.if %2 {
      %c0_56 = arith.constant 0 : index
      %c0_57 = arith.constant 0 : index
      %c0_58 = arith.constant 0 : index
      %209 = vector.load %arg2[%c0_56, %c0_57, %c0_58] : memref<2x8x32xf32, #tpu.memory_space<vmem>>, vector<2x8x32xf32>
      %210 = vector.shape_cast %209 : vector<2x8x32xf32> to vector<16x32xf32>
      %c0_59 = arith.constant 0 : index
      %c0_60 = arith.constant 0 : index
      %211 = vector.load %arg17[%c0_59, %c0_60] : memref<16x32xf32, #tpu.memory_space<vmem>>, vector<16x32xf32>
      tpu.vector_store %arg17[%c0_59, %c0_60], %210 {strides = array<i32>} : memref<16x32xf32, #tpu.memory_space<vmem>>, vector<16x32xf32>,
    } else {
    }
    %c0 = arith.constant 0 : index
    %c0_1 = arith.constant 0 : index
    %3 = vector.load %arg17[%c0, %c0_1] : memref<16x32xf32, #tpu.memory_space<vmem>>, vector<16x32xf32>
    %4 = arith.truncf %3 : vector<16x32xf32> to vector<16x32xbf16>
    %c0_2 = arith.constant 0 : index
    %c0_3 = arith.constant 0 : index
    %c0_4 = arith.constant 0 : index
    %5 = vector.load %arg3[%c0_2, %c0_3, %c0_4] : memref<2x1x8xf32, #tpu.memory_space<vmem>>, vector<2x1x8xf32>
    %6 = arith.index_cast %arg1 : i32 to index
    %c0_5 = arith.constant 0 : index
    %c0_6 = arith.constant 0 : index
    %7 = vector.load %arg8[%6, %c0_5, %c0_6] : memref<2x6x32xf32, #tpu.memory_space<vmem>>, vector<1x6x32xf32>
    %8 = vector.shape_cast %7 : vector<1x6x32xf32> to vector<6x32xf32>
    %9 = vector.extract_strided_slice %8 {offsets = [0, 0], sizes = [1, 32], strides = [1, 1]} : vector<6x32xf32> to vector<1x32xf32>
    %10 = vector.extract_strided_slice %8 {offsets = [1, 0], sizes = [1, 32], strides = [1, 1]} : vector<6x32xf32> to vector<1x32xf32>
    %11 = vector.extract_strided_slice %8 {offsets = [2, 0], sizes = [1, 32], strides = [1, 1]} : vector<6x32xf32> to vector<1x32xf32>
    %12 = vector.extract_strided_slice %8 {offsets = [3, 0], sizes = [1, 32], strides = [1, 1]} : vector<6x32xf32> to vector<1x32xf32>
    %13 = vector.extract_strided_slice %8 {offsets = [4, 0], sizes = [1, 32], strides = [1, 1]} : vector<6x32xf32> to vector<1x32xf32>
    %14 = vector.extract_strided_slice %8 {offsets = [5, 0], sizes = [1, 32], strides = [1, 1]} : vector<6x32xf32> to vector<1x32xf32>
    %15 = arith.index_cast %arg1 : i32 to index
    %c0_7 = arith.constant 0 : index
    %c0_8 = arith.constant 0 : index
    %16 = vector.load %arg5[%15, %c0_7, %c0_8] : memref<2x32x96xbf16, #tpu.memory_space<vmem>>, vector<1x32x96xbf16>
    %17 = vector.shape_cast %16 : vector<1x32x96xbf16> to vector<32x96xbf16>
    %cst = arith.constant dense<0.000000e+00> : vector<16x96xf32>
    %18 = tpu.matmul %4, %17, %cst {dimension_numbers = #tpu.dot_dimension_numbers<[1], [0], [0], [1], [0, 0, 1, 1], [], []>} : vector<16x32xbf16>, vector<32x96xbf16>, vector<16x96xf32> -> vector<16x96xf32>
    %19 = arith.index_cast %arg1 : i32 to index
    %c0_9 = arith.constant 0 : index
    %c0_10 = arith.constant 0 : index
    %20 = vector.load %arg6[%19, %c0_9, %c0_10] : memref<2x1x96xf32, #tpu.memory_space<vmem>>, vector<1x1x96xf32>
    %21 = vector.shape_cast %20 : vector<1x1x96xf32> to vector<1x96xf32>
    %22 = vector.broadcast %21 : vector<1x96xf32> to vector<16x96xf32>
    %23 = arith.addf %18, %22 : vector<16x96xf32>
    %24 = vector.extract_strided_slice %23 {offsets = [0, 0], sizes = [16, 8], strides = [1, 1]} : vector<16x96xf32> to vector<16x8xf32>
    %25 = vector.extract_strided_slice %23 {offsets = [0, 32], sizes = [16, 8], strides = [1, 1]} : vector<16x96xf32> to vector<16x8xf32>
    %26 = vector.extract_strided_slice %23 {offsets = [0, 64], sizes = [16, 8], strides = [1, 1]} : vector<16x96xf32> to vector<16x8xf32>
    %27 = vector.shape_cast %24 : vector<16x8xf32> to vector<2x8x8xf32>
    %28 = arith.truncf %27 : vector<2x8x8xf32> to vector<2x8x8xbf16>
    %29 = vector.shape_cast %25 : vector<16x8xf32> to vector<2x8x8xf32>
    %30 = arith.truncf %29 : vector<2x8x8xf32> to vector<2x8x8xbf16>
    %31 = vector.shape_cast %26 : vector<16x8xf32> to vector<2x8x8xf32>
    %32 = arith.truncf %31 : vector<2x8x8xf32> to vector<2x8x8xbf16>
    "tpu.trace_start"() <{level = 10 : i32, message = "gqd,gkd->gqk"}> : () -> ()
    %cst_11 = arith.constant dense<0.000000e+00> : vector<2x8x8xf32>
    %33 = tpu.matmul %28, %30, %cst_11 {dimension_numbers = #tpu.dot_dimension_numbers<[2], [2], [1], [1], [0, 0, 0, 1, 1, 1], [0], [0]>} : vector<2x8x8xbf16>, vector<2x8x8xbf16>, vector<2x8x8xf32> -> vector<2x8x8xf32>
    "tpu.trace_stop"() : () -> ()
    %cst_12 = arith.constant 0.353553385 : f32
    %34 = vector.broadcast %cst_12 : f32 to vector<2x8x8xf32>
    %35 = arith.mulf %33, %34 : vector<2x8x8xf32>
    %36 = vector.broadcast %5 : vector<2x1x8xf32> to vector<2x8x8xf32>
    %37 = arith.addf %35, %36 : vector<2x8x8xf32>
    %cst_13 = arith.constant dense<0xFF800000> : vector<2x8xf32>
    %38 = vector.multi_reduction <maximumf>, %37, %cst_13 [2] : vector<2x8x8xf32> to vector<2x8xf32>
    %39 = vector.shape_cast %38 : vector<2x8xf32> to vector<2x8x1xf32>
    %40 = vector.broadcast %39 : vector<2x8x1xf32> to vector<2x8x8xf32>
    %41 = arith.subf %37, %40 : vector<2x8x8xf32>
    %42 = math.exp %41 : vector<2x8x8xf32>
    %cst_14 = arith.constant dense<0.000000e+00> : vector<2x8xf32>
    %43 = vector.multi_reduction <add>, %42, %cst_14 [2] : vector<2x8x8xf32> to vector<2x8xf32>
    %44 = vector.shape_cast %43 : vector<2x8xf32> to vector<2x8x1xf32>
    %45 = tpu.reciprocal %44 {approx = true} : vector<2x8x1xf32> -> vector<2x8x1xf32>
    %46 = vector.broadcast %45 : vector<2x8x1xf32> to vector<2x8x8xf32>
    %47 = arith.mulf %42, %46 : vector<2x8x8xf32>
    %48 = arith.truncf %47 : vector<2x8x8xf32> to vector<2x8x8xbf16>
    "tpu.trace_start"() <{level = 10 : i32, message = "gqk,gkd->gqd"}> : () -> ()
    %cst_15 = arith.constant dense<0.000000e+00> : vector<2x8x8xf32>
    %49 = tpu.matmul %48, %32, %cst_15 {dimension_numbers = #tpu.dot_dimension_numbers<[2], [1], [1], [2], [0, 0, 0, 1, 1, 2], [0], [0]>} : vector<2x8x8xbf16>, vector<2x8x8xbf16>, vector<2x8x8xf32> -> vector<2x8x8xf32>
    "tpu.trace_stop"() : () -> ()
    %50 = vector.shape_cast %49 : vector<2x8x8xf32> to vector<16x8xf32>
    %51 = vector.extract_strided_slice %23 {offsets = [0, 8], sizes = [16, 8], strides = [1, 1]} : vector<16x96xf32> to vector<16x8xf32>
    %52 = vector.extract_strided_slice %23 {offsets = [0, 40], sizes = [16, 8], strides = [1, 1]} : vector<16x96xf32> to vector<16x8xf32>
    %53 = vector.extract_strided_slice %23 {offsets = [0, 72], sizes = [16, 8], strides = [1, 1]} : vector<16x96xf32> to vector<16x8xf32>
    %54 = vector.shape_cast %51 : vector<16x8xf32> to vector<2x8x8xf32>
    %55 = arith.truncf %54 : vector<2x8x8xf32> to vector<2x8x8xbf16>
    %56 = vector.shape_cast %52 : vector<16x8xf32> to vector<2x8x8xf32>
    %57 = arith.truncf %56 : vector<2x8x8xf32> to vector<2x8x8xbf16>
    %58 = vector.shape_cast %53 : vector<16x8xf32> to vector<2x8x8xf32>
    %59 = arith.truncf %58 : vector<2x8x8xf32> to vector<2x8x8xbf16>
    "tpu.trace_start"() <{level = 10 : i32, message = "gqd,gkd->gqk"}> : () -> ()
    %cst_16 = arith.constant dense<0.000000e+00> : vector<2x8x8xf32>
    %60 = tpu.matmul %55, %57, %cst_16 {dimension_numbers = #tpu.dot_dimension_numbers<[2], [2], [1], [1], [0, 0, 0, 1, 1, 1], [0], [0]>} : vector<2x8x8xbf16>, vector<2x8x8xbf16>, vector<2x8x8xf32> -> vector<2x8x8xf32>
    "tpu.trace_stop"() : () -> ()
    %cst_17 = arith.constant 0.353553385 : f32
    %61 = vector.broadcast %cst_17 : f32 to vector<2x8x8xf32>
    %62 = arith.mulf %60, %61 : vector<2x8x8xf32>
    %63 = vector.broadcast %5 : vector<2x1x8xf32> to vector<2x8x8xf32>
    %64 = arith.addf %62, %63 : vector<2x8x8xf32>
    %cst_18 = arith.constant dense<0xFF800000> : vector<2x8xf32>
    %65 = vector.multi_reduction <maximumf>, %64, %cst_18 [2] : vector<2x8x8xf32> to vector<2x8xf32>
    %66 = vector.shape_cast %65 : vector<2x8xf32> to vector<2x8x1xf32>
    %67 = vector.broadcast %66 : vector<2x8x1xf32> to vector<2x8x8xf32>
    %68 = arith.subf %64, %67 : vector<2x8x8xf32>
    %69 = math.exp %68 : vector<2x8x8xf32>
    %cst_19 = arith.constant dense<0.000000e+00> : vector<2x8xf32>
    %70 = vector.multi_reduction <add>, %69, %cst_19 [2] : vector<2x8x8xf32> to vector<2x8xf32>
    %71 = vector.shape_cast %70 : vector<2x8xf32> to vector<2x8x1xf32>
    %72 = tpu.reciprocal %71 {approx = true} : vector<2x8x1xf32> -> vector<2x8x1xf32>
    %73 = vector.broadcast %72 : vector<2x8x1xf32> to vector<2x8x8xf32>
    %74 = arith.mulf %69, %73 : vector<2x8x8xf32>
    %75 = arith.truncf %74 : vector<2x8x8xf32> to vector<2x8x8xbf16>
    "tpu.trace_start"() <{level = 10 : i32, message = "gqk,gkd->gqd"}> : () -> ()
    %cst_20 = arith.constant dense<0.000000e+00> : vector<2x8x8xf32>
    %76 = tpu.matmul %75, %59, %cst_20 {dimension_numbers = #tpu.dot_dimension_numbers<[2], [1], [1], [2], [0, 0, 0, 1, 1, 2], [0], [0]>} : vector<2x8x8xbf16>, vector<2x8x8xbf16>, vector<2x8x8xf32> -> vector<2x8x8xf32>
    "tpu.trace_stop"() : () -> ()
    %77 = vector.shape_cast %76 : vector<2x8x8xf32> to vector<16x8xf32>
    %78 = vector.extract_strided_slice %23 {offsets = [0, 16], sizes = [16, 8], strides = [1, 1]} : vector<16x96xf32> to vector<16x8xf32>
    %79 = vector.extract_strided_slice %23 {offsets = [0, 48], sizes = [16, 8], strides = [1, 1]} : vector<16x96xf32> to vector<16x8xf32>
    %80 = vector.extract_strided_slice %23 {offsets = [0, 80], sizes = [16, 8], strides = [1, 1]} : vector<16x96xf32> to vector<16x8xf32>
    %81 = vector.shape_cast %78 : vector<16x8xf32> to vector<2x8x8xf32>
    %82 = arith.truncf %81 : vector<2x8x8xf32> to vector<2x8x8xbf16>
    %83 = vector.shape_cast %79 : vector<16x8xf32> to vector<2x8x8xf32>
    %84 = arith.truncf %83 : vector<2x8x8xf32> to vector<2x8x8xbf16>
    %85 = vector.shape_cast %80 : vector<16x8xf32> to vector<2x8x8xf32>
    %86 = arith.truncf %85 : vector<2x8x8xf32> to vector<2x8x8xbf16>
    "tpu.trace_start"() <{level = 10 : i32, message = "gqd,gkd->gqk"}> : () -> ()
    %cst_21 = arith.constant dense<0.000000e+00> : vector<2x8x8xf32>
    %87 = tpu.matmul %82, %84, %cst_21 {dimension_numbers = #tpu.dot_dimension_numbers<[2], [2], [1], [1], [0, 0, 0, 1, 1, 1], [0], [0]>} : vector<2x8x8xbf16>, vector<2x8x8xbf16>, vector<2x8x8xf32> -> vector<2x8x8xf32>
    "tpu.trace_stop"() : () -> ()
    %cst_22 = arith.constant 0.353553385 : f32
    %88 = vector.broadcast %cst_22 : f32 to vector<2x8x8xf32>
    %89 = arith.mulf %87, %88 : vector<2x8x8xf32>
    %90 = vector.broadcast %5 : vector<2x1x8xf32> to vector<2x8x8xf32>
    %91 = arith.addf %89, %90 : vector<2x8x8xf32>
    %cst_23 = arith.constant dense<0xFF800000> : vector<2x8xf32>
    %92 = vector.multi_reduction <maximumf>, %91, %cst_23 [2] : vector<2x8x8xf32> to vector<2x8xf32>
    %93 = vector.shape_cast %92 : vector<2x8xf32> to vector<2x8x1xf32>
    %94 = vector.broadcast %93 : vector<2x8x1xf32> to vector<2x8x8xf32>
    %95 = arith.subf %91, %94 : vector<2x8x8xf32>
    %96 = math.exp %95 : vector<2x8x8xf32>
    %cst_24 = arith.constant dense<0.000000e+00> : vector<2x8xf32>
    %97 = vector.multi_reduction <add>, %96, %cst_24 [2] : vector<2x8x8xf32> to vector<2x8xf32>
    %98 = vector.shape_cast %97 : vector<2x8xf32> to vector<2x8x1xf32>
    %99 = tpu.reciprocal %98 {approx = true} : vector<2x8x1xf32> -> vector<2x8x1xf32>
    %100 = vector.broadcast %99 : vector<2x8x1xf32> to vector<2x8x8xf32>
    %101 = arith.mulf %96, %100 : vector<2x8x8xf32>
    %102 = arith.truncf %101 : vector<2x8x8xf32> to vector<2x8x8xbf16>
    "tpu.trace_start"() <{level = 10 : i32, message = "gqk,gkd->gqd"}> : () -> ()
    %cst_25 = arith.constant dense<0.000000e+00> : vector<2x8x8xf32>
    %103 = tpu.matmul %102, %86, %cst_25 {dimension_numbers = #tpu.dot_dimension_numbers<[2], [1], [1], [2], [0, 0, 0, 1, 1, 2], [0], [0]>} : vector<2x8x8xbf16>, vector<2x8x8xbf16>, vector<2x8x8xf32> -> vector<2x8x8xf32>
    "tpu.trace_stop"() : () -> ()
    %104 = vector.shape_cast %103 : vector<2x8x8xf32> to vector<16x8xf32>
    %105 = vector.extract_strided_slice %23 {offsets = [0, 24], sizes = [16, 8], strides = [1, 1]} : vector<16x96xf32> to vector<16x8xf32>
    %106 = vector.extract_strided_slice %23 {offsets = [0, 56], sizes = [16, 8], strides = [1, 1]} : vector<16x96xf32> to vector<16x8xf32>
    %107 = vector.extract_strided_slice %23 {offsets = [0, 88], sizes = [16, 8], strides = [1, 1]} : vector<16x96xf32> to vector<16x8xf32>
    %108 = vector.shape_cast %105 : vector<16x8xf32> to vector<2x8x8xf32>
    %109 = arith.truncf %108 : vector<2x8x8xf32> to vector<2x8x8xbf16>
    %110 = vector.shape_cast %106 : vector<16x8xf32> to vector<2x8x8xf32>
    %111 = arith.truncf %110 : vector<2x8x8xf32> to vector<2x8x8xbf16>
    %112 = vector.shape_cast %107 : vector<16x8xf32> to vector<2x8x8xf32>
    %113 = arith.truncf %112 : vector<2x8x8xf32> to vector<2x8x8xbf16>
    "tpu.trace_start"() <{level = 10 : i32, message = "gqd,gkd->gqk"}> : () -> ()
    %cst_26 = arith.constant dense<0.000000e+00> : vector<2x8x8xf32>
    %114 = tpu.matmul %109, %111, %cst_26 {dimension_numbers = #tpu.dot_dimension_numbers<[2], [2], [1], [1], [0, 0, 0, 1, 1, 1], [0], [0]>} : vector<2x8x8xbf16>, vector<2x8x8xbf16>, vector<2x8x8xf32> -> vector<2x8x8xf32>
    "tpu.trace_stop"() : () -> ()
    %cst_27 = arith.constant 0.353553385 : f32
    %115 = vector.broadcast %cst_27 : f32 to vector<2x8x8xf32>
    %116 = arith.mulf %114, %115 : vector<2x8x8xf32>
    %117 = vector.broadcast %5 : vector<2x1x8xf32> to vector<2x8x8xf32>
    %118 = arith.addf %116, %117 : vector<2x8x8xf32>
    %cst_28 = arith.constant dense<0xFF800000> : vector<2x8xf32>
    %119 = vector.multi_reduction <maximumf>, %118, %cst_28 [2] : vector<2x8x8xf32> to vector<2x8xf32>
    %120 = vector.shape_cast %119 : vector<2x8xf32> to vector<2x8x1xf32>
    %121 = vector.broadcast %120 : vector<2x8x1xf32> to vector<2x8x8xf32>
    %122 = arith.subf %118, %121 : vector<2x8x8xf32>
    %123 = math.exp %122 : vector<2x8x8xf32>
    %cst_29 = arith.constant dense<0.000000e+00> : vector<2x8xf32>
    %124 = vector.multi_reduction <add>, %123, %cst_29 [2] : vector<2x8x8xf32> to vector<2x8xf32>
    %125 = vector.shape_cast %124 : vector<2x8xf32> to vector<2x8x1xf32>
    %126 = tpu.reciprocal %125 {approx = true} : vector<2x8x1xf32> -> vector<2x8x1xf32>
    %127 = vector.broadcast %126 : vector<2x8x1xf32> to vector<2x8x8xf32>
    %128 = arith.mulf %123, %127 : vector<2x8x8xf32>
    %129 = arith.truncf %128 : vector<2x8x8xf32> to vector<2x8x8xbf16>
    "tpu.trace_start"() <{level = 10 : i32, message = "gqk,gkd->gqd"}> : () -> ()
    %cst_30 = arith.constant dense<0.000000e+00> : vector<2x8x8xf32>
    %130 = tpu.matmul %129, %113, %cst_30 {dimension_numbers = #tpu.dot_dimension_numbers<[2], [1], [1], [2], [0, 0, 0, 1, 1, 2], [0], [0]>} : vector<2x8x8xbf16>, vector<2x8x8xbf16>, vector<2x8x8xf32> -> vector<2x8x8xf32>
    "tpu.trace_stop"() : () -> ()
    %131 = vector.shape_cast %130 : vector<2x8x8xf32> to vector<16x8xf32>
    %132 = tpu.concatenate %50, %77, %104, %131 in 1 : vector<16x8xf32>, vector<16x8xf32>, vector<16x8xf32>, vector<16x8xf32> -> vector<16x32xf32>
    %133 = arith.truncf %132 : vector<16x32xf32> to vector<16x32xbf16>
    %134 = arith.index_cast %arg1 : i32 to index
    %c0_31 = arith.constant 0 : index
    %c0_32 = arith.constant 0 : index
    %135 = vector.load %arg7[%134, %c0_31, %c0_32] : memref<2x32x32xbf16, #tpu.memory_space<vmem>>, vector<1x32x32xbf16>
    %136 = vector.shape_cast %135 : vector<1x32x32xbf16> to vector<32x32xbf16>
    %cst_33 = arith.constant dense<0.000000e+00> : vector<16x32xf32>
    %137 = tpu.matmul %133, %136, %cst_33 {dimension_numbers = #tpu.dot_dimension_numbers<[1], [0], [0], [1], [0, 0, 1, 1], [], []>} : vector<16x32xbf16>, vector<32x32xbf16>, vector<16x32xf32> -> vector<16x32xf32>
    %138 = vector.broadcast %9 : vector<1x32xf32> to vector<16x32xf32>
    %139 = arith.addf %137, %138 : vector<16x32xf32>
    %140 = arith.addf %3, %139 : vector<16x32xf32>
    %cst_34 = arith.constant dense<0.000000e+00> : vector<16xf32>
    %141 = vector.multi_reduction <add>, %140, %cst_34 [1] : vector<16x32xf32> to vector<16xf32>
    %142 = vector.shape_cast %141 : vector<16xf32> to vector<16x1xf32>
    %cst_35 = arith.constant 3.200000e+01 : f32
    %143 = vector.broadcast %cst_35 : f32 to vector<16x1xf32>
    %144 = arith.divf %142, %143 : vector<16x1xf32>
    %145 = vector.broadcast %144 : vector<16x1xf32> to vector<16x32xf32>
    %146 = arith.subf %140, %145 : vector<16x32xf32>
    %147 = arith.mulf %146, %146 : vector<16x32xf32>
    %cst_36 = arith.constant dense<0.000000e+00> : vector<16xf32>
    %148 = vector.multi_reduction <add>, %147, %cst_36 [1] : vector<16x32xf32> to vector<16xf32>
    %149 = vector.shape_cast %148 : vector<16xf32> to vector<16x1xf32>
    %cst_37 = arith.constant 3.200000e+01 : f32
    %150 = vector.broadcast %cst_37 : f32 to vector<16x1xf32>
    %151 = arith.divf %149, %150 : vector<16x1xf32>
    %152 = vector.broadcast %144 : vector<16x1xf32> to vector<16x32xf32>
    %153 = arith.subf %140, %152 : vector<16x32xf32>
    %cst_38 = arith.constant 9.99999974E-6 : f32
    %154 = vector.broadcast %cst_38 : f32 to vector<16x1xf32>
    %155 = arith.addf %151, %154 : vector<16x1xf32>
    %156 = math.rsqrt %155 : vector<16x1xf32>
    %157 = vector.broadcast %156 : vector<16x1xf32> to vector<16x32xf32>
    %158 = arith.mulf %153, %157 : vector<16x32xf32>
    %159 = vector.broadcast %10 : vector<1x32xf32> to vector<16x32xf32>
    %160 = arith.mulf %158, %159 : vector<16x32xf32>
    %161 = vector.broadcast %11 : vector<1x32xf32> to vector<16x32xf32>
    %162 = arith.addf %160, %161 : vector<16x32xf32>
    %163 = arith.truncf %162 : vector<16x32xf32> to vector<16x32xbf16>
    %164 = arith.index_cast %arg1 : i32 to index
    %c0_39 = arith.constant 0 : index
    %c0_40 = arith.constant 0 : index
    %165 = vector.load %arg9[%164, %c0_39, %c0_40] : memref<2x32x2048xbf16, #tpu.memory_space<vmem>>, vector<1x32x2048xbf16>
    %166 = vector.shape_cast %165 : vector<1x32x2048xbf16> to vector<32x2048xbf16>
    %cst_41 = arith.constant dense<0.000000e+00> : vector<16x2048xf32>
    %167 = tpu.matmul %163, %166, %cst_41 {dimension_numbers = #tpu.dot_dimension_numbers<[1], [0], [0], [1], [0, 0, 1, 1], [], []>} : vector<16x32xbf16>, vector<32x2048xbf16>, vector<16x2048xf32> -> vector<16x2048xf32>
    %168 = arith.index_cast %arg1 : i32 to index
    %c0_42 = arith.constant 0 : index
    %c0_43 = arith.constant 0 : index
    %169 = vector.load %arg10[%168, %c0_42, %c0_43] : memref<2x1x2048xf32, #tpu.memory_space<vmem>>, vector<1x1x2048xf32>
    %170 = vector.shape_cast %169 : vector<1x1x2048xf32> to vector<1x2048xf32>
    %171 = vector.broadcast %170 : vector<1x2048xf32> to vector<16x2048xf32>
    %172 = arith.addf %167, %171 : vector<16x2048xf32>
    %cst_44 = arith.constant 0.000000e+00 : f32
    %173 = vector.broadcast %cst_44 : f32 to vector<16x2048xf32>
    %174 = arith.maximumf %172, %173 : vector<16x2048xf32>
    %175 = arith.truncf %174 : vector<16x2048xf32> to vector<16x2048xbf16>
    %176 = arith.index_cast %arg1 : i32 to index
    %c0_45 = arith.constant 0 : index
    %c0_46 = arith.constant 0 : index
    %177 = vector.load %arg11[%176, %c0_45, %c0_46] : memref<2x2048x32xbf16, #tpu.memory_space<vmem>>, vector<1x2048x32xbf16>
    %178 = vector.shape_cast %177 : vector<1x2048x32xbf16> to vector<2048x32xbf16>
    %cst_47 = arith.constant dense<0.000000e+00> : vector<16x32xf32>
    %179 = tpu.matmul %175, %178, %cst_47 {dimension_numbers = #tpu.dot_dimension_numbers<[1], [0], [0], [1], [0, 0, 1, 1], [], []>} : vector<16x2048xbf16>, vector<2048x32xbf16>, vector<16x32xf32> -> vector<16x32xf32>
    %180 = vector.broadcast %12 : vector<1x32xf32> to vector<16x32xf32>
    %181 = arith.addf %179, %180 : vector<16x32xf32>
    %182 = arith.addf %162, %181 : vector<16x32xf32>
    %cst_48 = arith.constant dense<0.000000e+00> : vector<16xf32>
    %183 = vector.multi_reduction <add>, %182, %cst_48 [1] : vector<16x32xf32> to vector<16xf32>
    %184 = vector.shape_cast %183 : vector<16xf32> to vector<16x1xf32>
    %cst_49 = arith.constant 3.200000e+01 : f32
    %185 = vector.broadcast %cst_49 : f32 to vector<16x1xf32>
    %186 = arith.divf %184, %185 : vector<16x1xf32>
    %187 = vector.broadcast %186 : vector<16x1xf32> to vector<16x32xf32>
    %188 = arith.subf %182, %187 : vector<16x32xf32>
    %189 = arith.mulf %188, %188 : vector<16x32xf32>
    %cst_50 = arith.constant dense<0.000000e+00> : vector<16xf32>
    %190 = vector.multi_reduction <add>, %189, %cst_50 [1] : vector<16x32xf32> to vector<16xf32>
    %191 = vector.shape_cast %190 : vector<16xf32> to vector<16x1xf32>
    %cst_51 = arith.constant 3.200000e+01 : f32
    %192 = vector.broadcast %cst_51 : f32 to vector<16x1xf32>
    %193 = arith.divf %191, %192 : vector<16x1xf32>
    %194 = vector.broadcast %186 : vector<16x1xf32> to vector<16x32xf32>
    %195 = arith.subf %182, %194 : vector<16x32xf32>
    %cst_52 = arith.constant 9.99999974E-6 : f32
    %196 = vector.broadcast %cst_52 : f32 to vector<16x1xf32>
    %197 = arith.addf %193, %196 : vector<16x1xf32>
    %198 = math.rsqrt %197 : vector<16x1xf32>
    %199 = vector.broadcast %198 : vector<16x1xf32> to vector<16x32xf32>
    %200 = arith.mulf %195, %199 : vector<16x32xf32>
    %201 = vector.broadcast %13 : vector<1x32xf32> to vector<16x32xf32>
    %202 = arith.mulf %200, %201 : vector<16x32xf32>
    %203 = vector.broadcast %14 : vector<1x32xf32> to vector<16x32xf32>
    %204 = arith.addf %202, %203 : vector<16x32xf32>
    %c0_53 = arith.constant 0 : index
    %c0_54 = arith.constant 0 : index
    %205 = vector.load %arg17[%c0_53, %c0_54] : memref<16x32xf32, #tpu.memory_space<vmem>>, vector<16x32xf32>
    tpu.vector_store %arg17[%c0_53, %c0_54], %204 {strides = array<i32>} : memref<16x32xf32, #tpu.memory_space<vmem>>, vector<16x32xf32>,
    %c1_i32 = arith.constant 1 : i32
    %206 = arith.cmpi eq, %arg1, %c1_i32 : i32
    %207 = arith.extui %206 : i1 to i32
    %c0_i32_55 = arith.constant 0 : i32
    %208 = arith.cmpi ne, %207, %c0_i32_55 : i32
    scf.if %208 {
      %209 = arith.truncf %204 : vector<16x32xf32> to vector<16x32xbf16>
      %c15_i32 = arith.constant 15 : i32
      %210 = tpu.dynamic_rotate %204 by %c15_i32 dim 0 : vector<16x32xf32>, i32 -> vector<16x32xf32>
      %211 = arith.truncf %210 : vector<16x32xf32> to vector<16x32xbf16>
      %c0_56 = arith.constant 0 : index
      %c0_57 = arith.constant 0 : index
      %c0_58 = arith.constant 0 : index
      %212 = vector.load %arg12[%c0_56, %c0_57, %c0_58] : memref<2x32x32xbf16, #tpu.memory_space<vmem>>, vector<1x32x32xbf16>
      %213 = vector.shape_cast %212 : vector<1x32x32xbf16> to vector<32x32xbf16>
      %cst_59 = arith.constant dense<0.000000e+00> : vector<16x32xf32>
      %214 = tpu.matmul %209, %213, %cst_59 {dimension_numbers = #tpu.dot_dimension_numbers<[1], [0], [0], [1], [0, 0, 1, 1], [], []>} : vector<16x32xbf16>, vector<32x32xbf16>, vector<16x32xf32> -> vector<16x32xf32>
      %c1 = arith.constant 1 : index
      %c0_60 = arith.constant 0 : index
      %c0_61 = arith.constant 0 : index
      %215 = vector.load %arg12[%c1, %c0_60, %c0_61] : memref<2x32x32xbf16, #tpu.memory_space<vmem>>, vector<1x32x32xbf16>
      %216 = vector.shape_cast %215 : vector<1x32x32xbf16> to vector<32x32xbf16>
      %cst_62 = arith.constant dense<0.000000e+00> : vector<16x32xf32>
      %217 = tpu.matmul %211, %216, %cst_62 {dimension_numbers = #tpu.dot_dimension_numbers<[1], [0], [0], [1], [0, 0, 1, 1], [], []>} : vector<16x32xbf16>, vector<32x32xbf16>, vector<16x32xf32> -> vector<16x32xf32>
      %218 = arith.addf %214, %217 : vector<16x32xf32>
      %c0_63 = arith.constant 0 : index
      %c0_64 = arith.constant 0 : index
      %219 = vector.load %arg13[%c0_63, %c0_64] : memref<1x32xf32, #tpu.memory_space<vmem>>, vector<1x32xf32>
      %220 = vector.broadcast %219 : vector<1x32xf32> to vector<16x32xf32>
      %221 = arith.addf %218, %220 : vector<16x32xf32>
      %cst_65 = arith.constant 0.000000e+00 : f32
      %222 = vector.broadcast %cst_65 : f32 to vector<16x32xf32>
      %223 = arith.maximumf %221, %222 : vector<16x32xf32>
      %224 = arith.truncf %223 : vector<16x32xf32> to vector<16x32xbf16>
      %c0_66 = arith.constant 0 : index
      %c0_67 = arith.constant 0 : index
      %225 = vector.load %arg14[%c0_66, %c0_67] : memref<32x128xbf16, #tpu.memory_space<vmem>>, vector<32x128xbf16>
      %cst_68 = arith.constant dense<0.000000e+00> : vector<16x128xf32>
      %226 = tpu.matmul %224, %225, %cst_68 {dimension_numbers = #tpu.dot_dimension_numbers<[1], [0], [0], [1], [0, 0, 1, 1], [], []>} : vector<16x32xbf16>, vector<32x128xbf16>, vector<16x128xf32> -> vector<16x128xf32>
      %c0_69 = arith.constant 0 : index
      %c0_70 = arith.constant 0 : index
      %227 = vector.load %arg15[%c0_69, %c0_70] : memref<1x128xf32, #tpu.memory_space<vmem>>, vector<1x128xf32>
      %228 = vector.broadcast %227 : vector<1x128xf32> to vector<16x128xf32>
      %229 = arith.addf %226, %228 : vector<16x128xf32>
      %cst_71 = arith.constant 0.000000e+00 : f32
      %230 = vector.broadcast %cst_71 : f32 to vector<16x128xf32>
      %231 = arith.maximumf %229, %230 : vector<16x128xf32>
      %232 = vector.shape_cast %231 : vector<16x128xf32> to vector<2x8x128xf32>
      %c0_72 = arith.constant 0 : index
      %c0_73 = arith.constant 0 : index
      %c0_74 = arith.constant 0 : index
      %233 = vector.load %arg4[%c0_72, %c0_73, %c0_74] : memref<2x8x1xf32, #tpu.memory_space<vmem>>, vector<2x8x1xf32>
      %234 = vector.broadcast %233 : vector<2x8x1xf32> to vector<2x8x128xf32>
      %235 = arith.mulf %232, %234 : vector<2x8x128xf32>
      %236 = arith.truncf %235 : vector<2x8x128xf32> to vector<2x8x128xbf16>
      %c0_75 = arith.constant 0 : index
      %c0_76 = arith.constant 0 : index
      %c0_77 = arith.constant 0 : index
      %237 = vector.load %arg16[%c0_75, %c0_76, %c0_77] : memref<2x8x128xbf16, #tpu.memory_space<vmem>>, vector<2x8x128xbf16>
      tpu.vector_store %arg16[%c0_75, %c0_76, %c0_77], %236 {strides = array<i32>} : memref<2x8x128xbf16, #tpu.memory_space<vmem>>, vector<2x8x128xbf16>,
    } else {
    }
    return
  }
  func.func @transform_0(%arg0: i32, %arg1: i32) -> (i32, i32, i32) {
    %c0_i32 = arith.constant 0 : i32
    %c0_i32_0 = arith.constant 0 : i32
    %c0_i32_1 = arith.constant 0 : i32
    return %arg0, %c0_i32, %c0_i32_0 : i32, i32, i32
  }
  func.func @transform_1(%arg0: i32, %arg1: i32) -> (i32, i32, i32) {
    %c0_i32 = arith.constant 0 : i32
    %c0_i32_0 = arith.constant 0 : i32
    %c0_i32_1 = arith.constant 0 : i32
    return %arg0, %c0_i32, %c0_i32_0 : i32, i32, i32
  }
  func.func @transform_2(%arg0: i32, %arg1: i32) -> (i32, i32, i32) {
    %c0_i32 = arith.constant 0 : i32
    %c0_i32_0 = arith.constant 0 : i32
    %c0_i32_1 = arith.constant 0 : i32
    return %arg0, %c0_i32, %c0_i32_0 : i32, i32, i32
  }
  func.func @transform_3(%arg0: i32, %arg1: i32) -> (i32, i32, i32) {
    %c0_i32 = arith.constant 0 : i32
    %c0_i32_0 = arith.constant 0 : i32
    %c0_i32_1 = arith.constant 0 : i32
    %c0_i32_2 = arith.constant 0 : i32
    return %c0_i32, %c0_i32_0, %c0_i32_1 : i32, i32, i32
  }
  func.func @transform_4(%arg0: i32, %arg1: i32) -> (i32, i32, i32) {
    %c0_i32 = arith.constant 0 : i32
    %c0_i32_0 = arith.constant 0 : i32
    %c0_i32_1 = arith.constant 0 : i32
    %c0_i32_2 = arith.constant 0 : i32
    return %c0_i32, %c0_i32_0, %c0_i32_1 : i32, i32, i32
  }
  func.func @transform_5(%arg0: i32, %arg1: i32) -> (i32, i32, i32) {
    %c0_i32 = arith.constant 0 : i32
    %c0_i32_0 = arith.constant 0 : i32
    %c0_i32_1 = arith.constant 0 : i32
    %c0_i32_2 = arith.constant 0 : i32
    return %c0_i32, %c0_i32_0, %c0_i32_1 : i32, i32, i32
  }
  func.func @transform_6(%arg0: i32, %arg1: i32) -> (i32, i32, i32) {
    %c0_i32 = arith.constant 0 : i32
    %c0_i32_0 = arith.constant 0 : i32
    %c0_i32_1 = arith.constant 0 : i32
    %c0_i32_2 = arith.constant 0 : i32
    return %c0_i32, %c0_i32_0, %c0_i32_1 : i32, i32, i32
  }
  func.func @transform_7(%arg0: i32, %arg1: i32) -> (i32, i32, i32) {
    %c0_i32 = arith.constant 0 : i32
    %c0_i32_0 = arith.constant 0 : i32
    %c0_i32_1 = arith.constant 0 : i32
    %c0_i32_2 = arith.constant 0 : i32
    return %c0_i32, %c0_i32_0, %c0_i32_1 : i32, i32, i32
  }
  func.func @transform_8(%arg0: i32, %arg1: i32) -> (i32, i32, i32) {
    %c0_i32 = arith.constant 0 : i32
    %c0_i32_0 = arith.constant 0 : i32
    %c0_i32_1 = arith.constant 0 : i32
    %c0_i32_2 = arith.constant 0 : i32
    return %c0_i32, %c0_i32_0, %c0_i32_1 : i32, i32, i32
  }
  func.func @transform_9(%arg0: i32, %arg1: i32) -> (i32, i32, i32) {
    %c0_i32 = arith.constant 0 : i32
    %c0_i32_0 = arith.constant 0 : i32
    %c0_i32_1 = arith.constant 0 : i32
    %c0_i32_2 = arith.constant 0 : i32
    return %c0_i32, %c0_i32_0, %c0_i32_1 : i32, i32, i32
  }
  func.func @transform_10(%arg0: i32, %arg1: i32) -> (i32, i32, i32) {
    %c0_i32 = arith.constant 0 : i32
    %c0_i32_0 = arith.constant 0 : i32
    %c0_i32_1 = arith.constant 0 : i32
    %c0_i32_2 = arith.constant 0 : i32
    return %c0_i32, %c0_i32_0, %c0_i32_1 : i32, i32, i32
  }
  func.func @transform_11(%arg0: i32, %arg1: i32) -> (i32, i32) {
    %c0_i32 = arith.constant 0 : i32
    %c0_i32_0 = arith.constant 0 : i32
    %c0_i32_1 = arith.constant 0 : i32
    return %c0_i32, %c0_i32_0 : i32, i32
  }
  func.func @transform_12(%arg0: i32, %arg1: i32) -> (i32, i32) {
    %c0_i32 = arith.constant 0 : i32
    %c0_i32_0 = arith.constant 0 : i32
    %c0_i32_1 = arith.constant 0 : i32
    return %c0_i32, %c0_i32_0 : i32, i32
  }
  func.func @transform_13(%arg0: i32, %arg1: i32) -> (i32, i32) {
    %c0_i32 = arith.constant 0 : i32
    %c0_i32_0 = arith.constant 0 : i32
    %c0_i32_1 = arith.constant 0 : i32
    return %c0_i32, %c0_i32_0 : i32, i32
  }
  func.func @transform_14(%arg0: i32, %arg1: i32) -> (i32, i32, i32) {
    %c0_i32 = arith.constant 0 : i32
    %c0_i32_0 = arith.constant 0 : i32
    %c0_i32_1 = arith.constant 0 : i32
    return %arg0, %c0_i32, %c0_i32_0 : i32, i32, i32
  }
}

</mosaic_0001>

<bundles_post_ra>
// kernel: tpu_custom_call.1
= control target key start
LH: loop header
LB: loop body
LE: loop exit
PB: predicated region body
PF: predicated region fallthrough
CT: control target
= control target key end

     0   :  { %19 = vsyncpa [#allocation4], 0  ;;  %s5066_s29 = smov 0   ;;  %s5068_s30 = smov 0   ;;  %s5704_s0 = inlined_call_operand.vmem [shape: f32[2,8,32], index: 0, kind: input, shape index: {}]   ;;  %s5705_s1 = inlined_call_operand.vmem [shape: f32[2,1,8], index: 1, kind: input, shape index: {}]   ;;  %s5706_s2 = inlined_call_operand.vmem [shape: f32[2,8,1], index: 2, kind: input, shape index: {}]   ;;  %s5707_s3 = inlined_call_operand.vmem [shape: bf16[2,32,96], index: 3, kind: input, shape index: {}]   ;;  %s5708_s4 = inlined_call_operand.vmem [shape: f32[2,1,96], index: 4, kind: input, shape index: {}]   ;;  %s5709_s5 = inlined_call_operand.vmem [shape: bf16[2,32,32], index: 5, kind: input, shape index: {}]   ;;  %s5710_s6 = inlined_call_operand.vmem [shape: f32[2,6,32], index: 6, kind: input, shape index: {}]   ;;  %s5711_s7 = inlined_call_operand.vmem [shape: bf16[2,32,2048], index: 7, kind: input, shape index: {}]   ;;  %s5712_s8 = inlined_call_operand.vmem [shape: f32[2,1,2048], index: 8, kind: input, shape index: {}]   ;;  %s5713_s9 = inlined_call_operand.vmem [shape: bf16[2,2048,32], index: 9, kind: input, shape index: {}]   ;;  %s5714_s10 = inlined_call_operand.vmem [shape: bf16[2,32,32], index: 10, kind: input, shape index: {}]   ;;  %s5715_s11 = inlined_call_operand.vmem [shape: f32[1,32], index: 11, kind: input, shape index: {}]   ;;  %s5716_s12 = inlined_call_operand.vmem [shape: bf16[32,128], index: 12, kind: input, shape index: {}]   ;;  %s5717_s13 = inlined_call_operand.vmem [shape: f32[1,128], index: 13, kind: input, shape index: {}]   ;;  %s5718_s14 = inlined_call_operand.hbm [shape: bf16[2,8,128], index: 14, kind: output, shape index: {}]  }
   0x1   :  { %s5070_s15 = smov 0  }
   0x2 LB: > { %s4071_s16 = sadd.s32 4294967295, %s4967_s15   ;;  %s34_s17 = sadd.s32 1, %s4963_s30  ;;  %s4967_s15 = sphi %s5070_s15, %s25_s15   ;;  %s4963_s30 = sphi %s5068_s30, %s5721_s30   ;;  %s4959_s29 = sphi %s5066_s29, %s5720_s29  }
   0x3   : > { %p35_p0 = scmp.ge.s32.totalorder %s34_s17, 2  ;;  %p4076_p1 = scmp.ge.s32.totalorder %s4967_s15, 1 }
   0x4   : > { %p447_p2 = scmp.lt.s32.totalorder %s4967_s15, 3 }
   0x5   : > { %s5723_s17 = smov (%p35_p0, %s34_s17), 0 }
   0x6   : > { %p448_p3 = pnand %p4076_p1, %p447_p2 }
   0x7   : > { %p4077_p4 = scmp.ne.s32.totalorder (!%p448_p3), %s4959_s29, 0 }
   0x8   : > { %451 = sbr.rel (%p448_p3) target bundleno = 4724 (0x1274), region = 76 }
   0xf   : > { %519 = sbr.rel (%p4077_p4) target bundleno = 22 (0x16), region = 80  ;;  %v520_v0 = vld [vmem:[%s5704_s0] sm:$0xff] (!%p4077_p4)  ;;  %vm522_vm0 = vcmask (!%p4077_p4), 261120   ;;  %v521_v1 = vld [vmem:[%s5704_s0 + $0x8] sm:$0xff] (!%p4077_p4) }
  0x10   : > { %523 = vst.msk [vmem:[#allocation2] sm:$0xff] (!%p4077_p4), %vm522_vm0, %v520_v0  ;;  %524 = vst.msk [vmem:[#allocation2 + $0x8] sm:$0xff] (!%p4077_p4), %vm522_vm0, %v521_v1 }
  0x16 PF: > { %s5095_s22 = sshll.u32 %s4959_s29, 4  ;;  %v4969_v2 = vmov 0.0   ;;  %vm4970_vm1 = vmmov 0   ;;  %vm560_vm2 = vcmask 261120   ;;  %s540_s20 = scalar_lea.vmem %s5708_s4, %s4959_s29  ;;  %vm610_vm3 = vcmask 64512  }
  0x17   : > { %4532 = vmatprep.subr.bf16.mxu0 %v4969_v2  ;;  %s535_s25 = scalar_lea.vmem %s5707_s3, %s5095_s22  ;;  %4536 = vmatprep.mubr.msk.bf16.mxu0 %vm4970_vm1, %v4969_v2  ;;  %s5111_s28 = scalar_lea.vmem %s5709_s5, %s5095_s22  ;;  %v5113_v4 = vld [vmem:[#allocation2] sm:$0xff]  ;;  %v5115_v5 = vld [vmem:[#allocation2 + $0x8] sm:$0xff]  ;;  %vm751_vm4 = vcmask 1043456   ;;  %vm1541_vm5 = vcmask 130048   ;;  %vm1544_vm6 = vcmask 195584  }
  0x18   : > { %v4735_v3 = vld [vmem:[%s535_s25] sm:$0xff]   ;;  %4540 = vmatprep.subr.bf16.mxu1 %v4969_v2  ;;  %4542 = vmatprep.mubr.msk.bf16.mxu1 %vm4970_vm1, %v4969_v2  ;;  %v4736_v6 = vld [vmem:[%s535_s25 + $0x8] sm:$0xff]   ;;  %v527_v7 = vpack.c.bf16 %v5115_v5, %v5113_v4  ;;  %s4971_s21 = smov 96   ;;  %s4972_s27 = smov 64  }
  0x19   : > { %4533 = vmatpush3.bf16.msra.mxu0 %v4735_v3  ;;  %v4081_v8 = vld [vmem:[%s540_s20] ss:$0 sm:$0xff]  ;;  %v5155_v29 = vld [vmem:[%s5705_s1 + $0x1] ss:$0 sm:$0xff]  ;;  %s4973_s18 = smov 88   ;;  %s4974_s19 = smov 120  }
  0x1a   : > { %4534 = vmatprep.subr.bf16.mxu0 %v4969_v2  ;;  %v5149_v22 = vld [vmem:[%s5705_s1] ss:$0 sm:$0xff]  ;;  %s4975_s20 = smov 56   ;;  %s4977_s23 = smov 112  }
  0x1b   : > { %s4978_s24 = smov 48   ;;  %s4979_s25 = smov 72  }
  0x1c   : > { %s4980_s26 = smov 104   ;;  %p4280_p5 = scmp.ne.s32.totalorder %s4959_s29, 1 }
  0x1d   : > { %4535 = vmatpush3.bf16.msra.mxu0 %v4736_v6  ;;  %vm4987_vm7 = vmmov (!%p4280_p5), 0  }
  0x1e   : > { %4546 = vmatprep.subr.bf16.mxu0 %v4969_v2 }
  0x20   : > { %4537 = vmatmul.mubr.msk.bf16.vlgmr.msra.gmra.mrb[0].mxu0 %vm560_vm2, %v527_v7 }
  0x21   : > { %4548 = vmatprep.mubr.msk.bf16.mxu0 %vm4970_vm1, %v4969_v2 }
  0xf3   : > { %v598_v9 = vpop.f32.mrb[0].mxu0 }
  0xf4   : > { %v599_v10 = vadd.f32 %v4081_v8, %v598_v9  ;;  %v4538_v11 = vpop.f32.mrb[1].mxu0 }
  0xf5   : > { %v601_v12 = vpop.f32.mrb[2].mxu0 }
  0xf6   : > { %v5128_v13 = vpack.c.bf16 %v599_v10, %v599_v10  ;;  %v602_v14 = vadd.f32 %v4081_v8, %v601_v12  ;;  %v4539_v15 = vpop.f32.mrb[3].mxu0 }
  0xf8   : > { %608 = vrot.lane.b32.xlu0 %v5128_v13, %s4971_s21  ;;  %v5131_v16 = vpack.c.bf16 %v602_v14, %v602_v14 }
  0xfc   : > { %658 = vrot.lane.b32.xlu0 %v5131_v16, %s4971_s21  ;;  %s4976_s21 = smov 80  }
 0x16a   : > { %v609_v17 = vpop.permute.xlu0 %608 }
 0x16b   : > { %v615_v18 = vsel %vm610_vm3, %v609_v17, 0 }
 0x16c   : > { %4541 = vmatpush3.bf16.xpose.msra.mxu1 %v615_v18 }
 0x16d   : > { %4552 = vmatprep.subr.bf16.mxu1 %v4969_v2 }
 0x16e   : > { %v659_v19 = vpop.permute.xlu0 %658 }
 0x16f   : > { %v664_v20 = vsel %vm610_vm3, %v659_v19, 0 }
 0x170   : > { %4547 = vmatpush3.bf16.xpose.msra.mxu0 %v664_v20 }
 0x171   : > { %4558 = vmatprep.subr.bf16.mxu0 %v4969_v2 }
 0x173   : > { %4543 = vmatmul.mubr.msk.bf16.vlgmr.msra.gmra.mrb[0].mxu1 %vm610_vm3, %v5128_v13 }
 0x174   : > { %4554 = vmatprep.mubr.msk.bf16.mxu1 %vm4970_vm1, %v4969_v2 }
 0x177   : > { %4549 = vmatmul.mubr.msk.bf16.vlgmr.msra.gmra.mrb[4].mxu0 %vm610_vm3, %v5131_v16 }
 0x178   : > { %4560 = vmatprep.mubr.msk.bf16.mxu0 %vm4970_vm1, %v4969_v2 }
 0x246   : > { %v651_v21 = vpop.f32.mrb[0].mxu1 }
 0x247   : > { %v706_v23 = vmul.f32 0.35355338, %v651_v21  ;;  %v4544_v24 = vpop.f32.mrb[1].mxu1 }
 0x248   : > { %v654_v25 = vpop.f32.mrb[2].mxu1 }
 0x249   : > { %v4545_v26 = vpop.f32.mrb[3].mxu1  ;;  %v720_v27 = vadd.f32 %v5149_v22, %v706_v23 }
 0x24a   : > { %v700_v28 = vpop.f32.mrb[4].mxu0 }
 0x24b   : > { %v707_v30 = vmul.f32 0.35355338, %v700_v28  ;;  %v4550_v31 = vpop.f32.mrb[5].mxu0  ;;  %v722_v32 = vsel %vm610_vm3, %v720_v27, -inf }
 0x24c   : > { %723 = vmax.xlane.f32.xlu1 %v722_v32  ;;  %v703_v33 = vpop.f32.mrb[6].mxu0 }
 0x24d   : > { %v4551_v34 = vpop.f32.mrb[7].mxu0  ;;  %v721_v35 = vadd.f32 %v5155_v29, %v707_v30 }
 0x24f   : > { %v725_v36 = vsel %vm610_vm3, %v721_v35, -inf }
 0x250   : > { %726 = vmax.xlane.f32.xlu1 %v725_v36 }
 0x261   : > { %746 = vrot.lane.b32.xlu1 %v5128_v13, %s4972_s27 }
 0x265   : > { %795 = vrot.lane.b32.xlu1 %v5131_v16, %s4972_s27 }
 0x269   : > { %845 = vrot.lane.b32.xlu1 %v5128_v13, %s4973_s18 }
 0x2d9   : > { %v724_v37 = vpop.xlane.xlu1 %723 }
 0x2da   : > { %v728_v38 = vsub.f32 %v720_v27, %v724_v37 }
 0x2dc   : > { %v730_v39 = vmul.f32 1.442695, %v728_v38 }
 0x2dd   : > { %v727_v40 = vpop.xlane.xlu1 %726 }
 0x2de   : > { %4867 = vpow2.f32 %v730_v39  ;;  %v729_v41 = vsub.f32 %v721_v35, %v727_v40 }
 0x2e0   : > { %v732_v42 = vmul.f32 1.442695, %v729_v41 }
 0x2e1   : > { %v747_v43 = vpop.permute.xlu1 %746 }
 0x2e2   : > { %4869 = vpow2.f32 %v732_v42  ;;  %v753_v44 = vsel %vm751_vm4, %v747_v43, 0 }
 0x2e3   : > { %4553 = vmatpush3.bf16.msra.mxu1 %v753_v44 }
 0x2e4   : > { %4564 = vmatprep.subr.bf16.mxu1 %v4969_v2 }
 0x2e5   : > { %v796_v45 = vpop.permute.xlu1 %795 }
 0x2e6   : > { %v801_v46 = vsel %vm751_vm4, %v796_v45, 0 }
 0x2e7   : > { %4559 = vmatpush3.bf16.msra.mxu0 %v801_v46 }
 0x2e8   : > { %v4868_v47 = vpop.eup %4867  ;;  %4570 = vmatprep.subr.bf16.mxu0 %v4969_v2 }
 0x2e9   : > { %v734_v48 = vsel %vm610_vm3, %v4868_v47, 0.0  ;;  %v846_v51 = vpop.permute.xlu1 %845 }
 0x2ea   : > { %735 = vadd.xlane.f32.xlu0 %v734_v48  ;;  %v851_v58 = vsel %vm610_vm3, %v846_v51, 0 }
 0x2ec   : > { %v4870_v49 = vpop.eup %4869 }
 0x2ed   : > { %v737_v50 = vsel %vm610_vm3, %v4870_v49, 0.0 }
 0x2ee   : > { %738 = vadd.xlane.f32.xlu1 %v737_v50 }
 0x2ff   : > { %895 = vrot.lane.b32.xlu1 %v5131_v16, %s4973_s18  ;;  %s4981_s18 = smov 40  }
 0x300   : > { %843 = vrot.lane.b32.xlu0 %v5128_v13, %s4974_s19 }
 0x303   : > { %893 = vrot.lane.b32.xlu1 %v5131_v16, %s4974_s19  ;;  %s4982_s19 = smov 8  }
 0x377   : > { %v736_v52 = vpop.xlane.xlu0 %735 }
 0x378   : > { %4871 = vrcp.f32 %v736_v52 }
 0x37b   : > { %v739_v53 = vpop.xlane.xlu1 %738  ;;  %v844_v63 = vpop.permute.xlu0 %843 }
 0x37c   : > { %4873 = vrcp.f32 %v739_v53 }
 0x37f   : > { %v896_v60 = vpop.permute.xlu1 %895 }
 0x380   : > { %v901_v62 = vsel %vm610_vm3, %v896_v60, 0 }
 0x382   : > { %v4872_v54 = vpop.eup %4871 }
 0x383   : > { %v742_v55 = vmul.f32 %v4872_v54, %v4868_v47  ;;  %v894_v0 = vpop.permute.xlu1 %893 }
 0x385   : > { %v744_v56 = vpack.c.bf16 %v742_v55, %v742_v55 }
 0x386   : > { %v4874_v57 = vpop.eup %4873 }
 0x387   : > { %v743_v59 = vmul.f32 %v4874_v57, %v4870_v49  ;;  %4555 = vmatmul.mubr.msk.bf16.vlgmr.msra.gmra.mrb[4].mxu1 %vm610_vm3, %v744_v56 }
 0x388   : > { %4565 = vmatpush3.bf16.xpose.msra.mxu1 %v851_v58  ;;  %4566 = vmatprep.mubr.msk.bf16.mxu1 %vm4970_vm1, %v4969_v2 }
 0x389   : > { %v745_v61 = vpack.c.bf16 %v743_v59, %v743_v59  ;;  %4576 = vmatprep.subr.bf16.mxu1 %v4969_v2 }
 0x38b   : > { %4561 = vmatmul.mubr.msk.bf16.vlgmr.msra.gmra.mrb[8].mxu0 %vm610_vm3, %v745_v61 }
 0x38c   : > { %4571 = vmatpush3.bf16.xpose.msra.mxu0 %v901_v62  ;;  %4572 = vmatprep.mubr.msk.bf16.mxu0 %vm4970_vm1, %v4969_v2 }
 0x38d   : > { %4582 = vmatprep.subr.bf16.mxu0 %v4969_v2 }
 0x38f   : > { %4567 = vmatmul.mubr.msk.bf16.vlgmr.msra.gmra.mrb[8].mxu1 %vm610_vm3, %v844_v63 }
 0x390   : > { %4578 = vmatprep.mubr.msk.bf16.mxu1 %vm4970_vm1, %v4969_v2 }
 0x393   : > { %4573 = vmatmul.mubr.msk.bf16.vlgmr.msra.gmra.mrb[12].mxu0 %vm610_vm3, %v894_v0 }
 0x394   : > { %4584 = vmatprep.mubr.msk.bf16.mxu0 %vm4970_vm1, %v4969_v2 }
 0x45a   : > { %v5190_v1 = vpop.f32.mrb[4].mxu1 }
 0x45b   : > { %v4556_v3 = vpop.f32.mrb[5].mxu1 }
 0x45c   : > { %v792_v6 = vpop.f32.mrb[6].mxu1 }
 0x45d   : > { %v4557_v7 = vpop.f32.mrb[7].mxu1 }
 0x45e   : > { %v5192_v8 = vpop.f32.mrb[8].mxu0 }
 0x45f   : > { %v4562_v9 = vpop.f32.mrb[9].mxu0 }
 0x460   : > { %v840_v10 = vpop.f32.mrb[10].mxu0 }
 0x461   : > { %v4563_v11 = vpop.f32.mrb[11].mxu0 }
 0x462   : > { %v887_v12 = vpop.f32.mrb[8].mxu1 }
 0x463   : > { %v943_v14 = vmul.f32 0.35355338, %v887_v12  ;;  %v4568_v15 = vpop.f32.mrb[9].mxu1 }
 0x464   : > { %v890_v17 = vpop.f32.mrb[10].mxu1 }
 0x465   : > { %v4569_v18 = vpop.f32.mrb[11].mxu1  ;;  %v945_v19 = vadd.f32 %v5149_v22, %v943_v14 }
 0x466   : > { %v937_v20 = vpop.f32.mrb[12].mxu0 }
 0x467   : > { %v944_v21 = vmul.f32 0.35355338, %v937_v20  ;;  %v4574_v23 = vpop.f32.mrb[13].mxu0  ;;  %v947_v24 = vsel %vm610_vm3, %v945_v19, -inf }
 0x468   : > { %948 = vmax.xlane.f32.xlu1 %v947_v24  ;;  %v940_v25 = vpop.f32.mrb[14].mxu0 }
 0x469   : > { %v4575_v26 = vpop.f32.mrb[15].mxu0  ;;  %v946_v27 = vadd.f32 %v5155_v29, %v944_v21 }
 0x46b   : > { %v950_v28 = vsel %vm610_vm3, %v946_v27, -inf }
 0x46c   : > { %951 = vmax.xlane.f32.xlu0 %v950_v28 }
 0x479   : > { %971 = vrot.lane.b32.xlu1 %v5128_v13, %s4975_s20 }
 0x47d   : > { %1069 = vrot.lane.b32.xlu1 %v5128_v13, %s4976_s21 }
 0x482   : > { %1019 = vrot.lane.b32.xlu0 %v5131_v16, %s4975_s20  ;;  %s4983_s20 = smov 16  }
 0x486   : > { %1067 = vrot.lane.b32.xlu0 %v5128_v13, %s4977_s23 }
 0x4f5   : > { %v949_v30 = vpop.xlane.xlu1 %948 }
 0x4f6   : > { %v953_v31 = vsub.f32 %v945_v19, %v949_v30 }
 0x4f8   : > { %v955_v32 = vmul.f32 1.442695, %v953_v31 }
 0x4f9   : > { %v972_v33 = vpop.permute.xlu1 %971  ;;  %v952_v34 = vpop.xlane.xlu0 %951 }
 0x4fa   : > { %4875 = vpow2.f32 %v955_v32  ;;  %v977_v35 = vsel %vm751_vm4, %v972_v33, 0  ;;  %v954_v36 = vsub.f32 %v946_v27, %v952_v34 }
 0x4fb   : > { %4577 = vmatpush3.bf16.msra.mxu1 %v977_v35 }
 0x4fc   : > { %v957_v37 = vmul.f32 1.442695, %v954_v36  ;;  %4588 = vmatprep.subr.bf16.mxu1 %v4969_v2 }
 0x4fd   : > { %v1020_v38 = vpop.permute.xlu0 %1019  ;;  %v1070_v44 = vpop.permute.xlu1 %1069 }
 0x4fe   : > { %4877 = vpow2.f32 %v957_v37  ;;  %v1025_v39 = vsel %vm751_vm4, %v1020_v38, 0  ;;  %v1075_v51 = vsel %vm610_vm3, %v1070_v44, 0 }
 0x4ff   : > { %4583 = vmatpush3.bf16.msra.mxu0 %v1025_v39 }
 0x500   : > { %4594 = vmatprep.subr.bf16.mxu0 %v4969_v2 }
 0x501   : > { %v1068_v56 = vpop.permute.xlu0 %1067 }
 0x504   : > { %v4876_v40 = vpop.eup %4875 }
 0x505   : > { %v959_v41 = vsel %vm610_vm3, %v4876_v40, 0.0 }
 0x506   : > { %960 = vadd.xlane.f32.xlu1 %v959_v41 }
 0x508   : > { %v4878_v42 = vpop.eup %4877 }
 0x509   : > { %v962_v43 = vsel %vm610_vm3, %v4878_v42, 0.0 }
 0x50a   : > { %963 = vadd.xlane.f32.xlu1 %v962_v43 }
 0x51b   : > { %1119 = vrot.lane.b32.xlu1 %v5131_v16, %s4976_s21  ;;  %s4984_s21 = smov 24  }
 0x51f   : > { %1117 = vrot.lane.b32.xlu1 %v5131_v16, %s4977_s23 }
 0x593   : > { %v961_v45 = vpop.xlane.xlu1 %960 }
 0x594   : > { %4879 = vrcp.f32 %v961_v45 }
 0x597   : > { %v964_v46 = vpop.xlane.xlu1 %963 }
 0x598   : > { %4881 = vrcp.f32 %v964_v46 }
 0x59b   : > { %v1120_v53 = vpop.permute.xlu1 %1119 }
 0x59c   : > { %v1125_v55 = vsel %vm610_vm3, %v1120_v53, 0 }
 0x59e   : > { %v4880_v47 = vpop.eup %4879 }
 0x59f   : > { %v967_v48 = vmul.f32 %v4880_v47, %v4876_v40  ;;  %v1118_v57 = vpop.permute.xlu1 %1117 }
 0x5a1   : > { %v969_v49 = vpack.c.bf16 %v967_v48, %v967_v48 }
 0x5a2   : > { %v4882_v50 = vpop.eup %4881 }
 0x5a3   : > { %v968_v52 = vmul.f32 %v4882_v50, %v4878_v42  ;;  %4579 = vmatmul.mubr.msk.bf16.vlgmr.msra.gmra.mrb[12].mxu1 %vm610_vm3, %v969_v49 }
 0x5a4   : > { %4589 = vmatpush3.bf16.xpose.msra.mxu1 %v1075_v51  ;;  %4590 = vmatprep.mubr.msk.bf16.mxu1 %vm4970_vm1, %v4969_v2 }
 0x5a5   : > { %v970_v54 = vpack.c.bf16 %v968_v52, %v968_v52  ;;  %4600 = vmatprep.subr.bf16.mxu1 %v4969_v2 }
 0x5a7   : > { %4585 = vmatmul.mubr.msk.bf16.vlgmr.msra.gmra.mrb[16].mxu0 %vm610_vm3, %v970_v54 }
 0x5a8   : > { %4595 = vmatpush3.bf16.xpose.msra.mxu0 %v1125_v55  ;;  %4596 = vmatprep.mubr.msk.bf16.mxu0 %vm4970_vm1, %v4969_v2 }
 0x5a9   : > { %4606 = vmatprep.subr.bf16.mxu0 %v4969_v2 }
 0x5ab   : > { %4591 = vmatmul.mubr.msk.bf16.vlgmr.msra.gmra.mrb[16].mxu1 %vm610_vm3, %v1068_v56 }
 0x5ac   : > { %4602 = vmatprep.mubr.msk.bf16.mxu1 %vm4970_vm1, %v4969_v2 }
 0x5af   : > { %4597 = vmatmul.mubr.msk.bf16.vlgmr.msra.gmra.mrb[20].mxu0 %vm610_vm3, %v1118_v57 }
 0x5b0   : > { %4608 = vmatprep.mubr.msk.bf16.mxu0 %vm4970_vm1, %v4969_v2 }
 0x676   : > { %v5226_v58 = vpop.f32.mrb[12].mxu1 }
 0x677   : > { %v4580_v59 = vpop.f32.mrb[13].mxu1 }
 0x678   : > { %v1016_v60 = vpop.f32.mrb[14].mxu1 }
 0x679   : > { %v4581_v61 = vpop.f32.mrb[15].mxu1 }
 0x67a   : > { %v5228_v62 = vpop.f32.mrb[16].mxu0 }
 0x67b   : > { %v4720_v63 = vpack.i.bf16 %v5228_v62, %v5226_v58  ;;  %v4586_v0 = vpop.f32.mrb[17].mxu0 }
 0x67c   : > { %v1064_v3 = vpop.f32.mrb[18].mxu0 }
 0x67d   : > { %v4587_v6 = vpop.f32.mrb[19].mxu0 }
 0x67e   : > { %v1111_v7 = vpop.f32.mrb[16].mxu1 }
 0x67f   : > { %v1167_v9 = vmul.f32 0.35355338, %v1111_v7  ;;  %v4592_v10 = vpop.f32.mrb[17].mxu1 }
 0x680   : > { %v1114_v11 = vpop.f32.mrb[18].mxu1 }
 0x681   : > { %v4593_v12 = vpop.f32.mrb[19].mxu1  ;;  %v1169_v14 = vadd.f32 %v5149_v22, %v1167_v9 }
 0x682   : > { %v1161_v15 = vpop.f32.mrb[20].mxu0 }
 0x683   : > { %v1168_v17 = vmul.f32 0.35355338, %v1161_v15  ;;  %v4598_v18 = vpop.f32.mrb[21].mxu0  ;;  %v1171_v19 = vsel %vm610_vm3, %v1169_v14, -inf }
 0x684   : > { %1172 = vmax.xlane.f32.xlu0 %v1171_v19  ;;  %v1164_v20 = vpop.f32.mrb[22].mxu0 }
 0x685   : > { %v4599_v21 = vpop.f32.mrb[23].mxu0  ;;  %v1170_v23 = vadd.f32 %v5155_v29, %v1168_v17 }
 0x687   : > { %v1174_v24 = vsel %vm610_vm3, %v1170_v23, -inf }
 0x688   : > { %1175 = vmax.xlane.f32.xlu1 %v1174_v24 }
 0x699   : > { %1195 = vrot.lane.b32.xlu1 %v5128_v13, %s4978_s24 }
 0x69d   : > { %1293 = vrot.lane.b32.xlu1 %v5128_v13, %s4979_s25 }
 0x6a1   : > { %1343 = vrot.lane.b32.xlu1 %v5131_v16, %s4979_s25 }
 0x6a5   : > { %1341 = vrot.lane.b32.xlu1 %v5131_v16, %s4980_s26 }
 0x711   : > { %v1173_v25 = vpop.xlane.xlu0 %1172 }
 0x712   : > { %v1177_v26 = vsub.f32 %v1169_v14, %v1173_v25 }
 0x714   : > { %v1179_v27 = vmul.f32 1.442695, %v1177_v26 }
 0x715   : > { %v1176_v28 = vpop.xlane.xlu1 %1175 }
 0x716   : > { %4883 = vpow2.f32 %v1179_v27  ;;  %v1178_v30 = vsub.f32 %v1170_v23, %v1176_v28 }
 0x718   : > { %v1181_v31 = vmul.f32 1.442695, %v1178_v30 }
 0x719   : > { %v1196_v32 = vpop.permute.xlu1 %1195 }
 0x71a   : > { %4885 = vpow2.f32 %v1181_v31  ;;  %v1201_v33 = vsel %vm751_vm4, %v1196_v32, 0 }
 0x71b   : > { %4601 = vmatpush3.bf16.msra.mxu1 %v1201_v33 }
 0x71c   : > { %4612 = vmatprep.subr.bf16.mxu1 %v4969_v2 }
 0x71d   : > { %v1294_v43 = vpop.permute.xlu1 %1293 }
 0x71e   : > { %v1299_v47 = vsel %vm610_vm3, %v1294_v43, 0 }
 0x720   : > { %v4884_v34 = vpop.eup %4883 }
 0x721   : > { %v1183_v35 = vsel %vm610_vm3, %v4884_v34, 0.0  ;;  %v1344_v49 = vpop.permute.xlu1 %1343 }
 0x722   : > { %1184 = vadd.xlane.f32.xlu0 %v1183_v35  ;;  %v1349_v51 = vsel %vm610_vm3, %v1344_v49, 0 }
 0x724   : > { %v4886_v36 = vpop.eup %4885 }
 0x725   : > { %v1186_v37 = vsel %vm610_vm3, %v4886_v36, 0.0  ;;  %v1342_v53 = vpop.permute.xlu1 %1341 }
 0x726   : > { %1187 = vadd.xlane.f32.xlu0 %v1186_v37 }
 0x73c   : > { %1243 = vrot.lane.b32.xlu0 %v5131_v16, %s4978_s24 }
 0x740   : > { %1291 = vrot.lane.b32.xlu0 %v5128_v13, %s4980_s26  ;;  %s4302_s26 = sshll.u32 %s4959_s29, 8 }
 0x7af   : > { %v1185_v38 = vpop.xlane.xlu0 %1184 }
 0x7b0   : > { %4887 = vrcp.f32 %v1185_v38 }
 0x7b3   : > { %v1188_v39 = vpop.xlane.xlu0 %1187 }
 0x7b4   : > { %4889 = vrcp.f32 %v1188_v39 }
 0x7b7   : > { %v1244_v40 = vpop.permute.xlu0 %1243 }
 0x7b8   : > { %v1249_v41 = vsel %vm751_vm4, %v1244_v40, 0  ;;  %v4737_v40 = vld [vmem:[%s5111_s28] sm:$0xff]  }
 0x7b9   : > { %4607 = vmatpush3.bf16.msra.mxu0 %v1249_v41  ;;  %v4738_v41 = vld [vmem:[%s5111_s28 + $0x8] sm:$0xff]   ;;  %s4078_s28 = sshll.u32 %s4959_s29, 3 }
 0x7ba   : > { %v4888_v42 = vpop.eup %4887  ;;  %4618 = vmatprep.subr.bf16.mxu0 %v4969_v2  ;;  %s5296_s25 = scalar_lea.vmem %s5710_s6, %s4078_s28 }
 0x7bb   : > { %v1191_v44 = vmul.f32 %v4888_v42, %v4884_v34  ;;  %v1292_v52 = vpop.permute.xlu0 %1291 }
 0x7bd   : > { %v1193_v45 = vpack.c.bf16 %v1191_v44, %v1191_v44 }
 0x7be   : > { %v4890_v46 = vpop.eup %4889 }
 0x7bf   : > { %v1192_v48 = vmul.f32 %v4890_v46, %v4886_v36  ;;  %4603 = vmatmul.mubr.msk.bf16.vlgmr.msra.gmra.mrb[20].mxu1 %vm610_vm3, %v1193_v45 }
 0x7c0   : > { %4613 = vmatpush3.bf16.xpose.msra.mxu1 %v1299_v47  ;;  %4614 = vmatprep.mubr.msk.bf16.mxu1 %vm4970_vm1, %v4969_v2 }
 0x7c1   : > { %v1194_v50 = vpack.c.bf16 %v1192_v48, %v1192_v48  ;;  %4624 = vmatprep.subr.bf16.mxu1 %v4969_v2 }
 0x7c3   : > { %4609 = vmatmul.mubr.msk.bf16.vlgmr.msra.gmra.mrb[24].mxu0 %vm610_vm3, %v1194_v50 }
 0x7c4   : > { %4619 = vmatpush3.bf16.xpose.msra.mxu0 %v1349_v51  ;;  %4620 = vmatprep.mubr.msk.bf16.mxu0 %vm4970_vm1, %v4969_v2 }
 0x7c5   : > { %4630 = vmatprep.subr.bf16.mxu0 %v4969_v2 }
 0x7c7   : > { %4615 = vmatmul.mubr.msk.bf16.vlgmr.msra.gmra.mrb[24].mxu1 %vm610_vm3, %v1292_v52 }
 0x7c8   : > { %4626 = vmatprep.mubr.msk.bf16.mxu1 %vm4970_vm1, %v4969_v2 }
 0x7cb   : > { %4621 = vmatmul.mubr.msk.bf16.vlgmr.msra.gmra.mrb[28].mxu0 %vm610_vm3, %v1342_v53 }
 0x7cc   : > { %4632 = vmatprep.mubr.msk.bf16.mxu0 %vm4970_vm1, %v4969_v2 }
 0x892   : > { %v1237_v54 = vpop.f32.mrb[20].mxu1 }
 0x893   : > { %v4604_v55 = vpop.f32.mrb[21].mxu1 }
 0x894   : > { %v1240_v56 = vpop.f32.mrb[22].mxu1 }
 0x895   : > { %v4605_v57 = vpop.f32.mrb[23].mxu1 }
 0x896   : > { %v1285_v59 = vpop.f32.mrb[24].mxu0 }
 0x897   : > { %v4725_v60 = vpack.i.bf16 %v1285_v59, %v1237_v54  ;;  %v4610_v61 = vpop.f32.mrb[25].mxu0 }
 0x898   : > { %v1288_v0 = vpop.f32.mrb[26].mxu0 }
 0x899   : > { %v4611_v3 = vpop.f32.mrb[27].mxu0 }
 0x89a   : > { %v1335_v6 = vpop.f32.mrb[24].mxu1 }
 0x89b   : > { %v1391_v7 = vmul.f32 0.35355338, %v1335_v6  ;;  %v4616_v9 = vpop.f32.mrb[25].mxu1 }
 0x89c   : > { %v1338_v10 = vpop.f32.mrb[26].mxu1 }
 0x89d   : > { %v4617_v11 = vpop.f32.mrb[27].mxu1  ;;  %v1393_v12 = vadd.f32 %v5149_v22, %v1391_v7  ;;  %v1554_v10 = vlaneseq }
 0x89e   : > { %v1385_v14 = vpop.f32.mrb[28].mxu0 }
 0x89f   : > { %v1392_v15 = vmul.f32 0.35355338, %v1385_v14  ;;  %v4622_v17 = vpop.f32.mrb[29].mxu0  ;;  %v1395_v18 = vsel %vm610_vm3, %v1393_v12, -inf  ;;  %v5291_v11 = vshrl.u32 %v1554_v10, 7 }
 0x8a0   : > { %1396 = vmax.xlane.f32.xlu0 %v1395_v18  ;;  %v1388_v19 = vpop.f32.mrb[30].mxu0 }
 0x8a1   : > { %v4623_v20 = vpop.f32.mrb[31].mxu0  ;;  %v1394_v21 = vadd.f32 %v5155_v29, %v1392_v15  ;;  %vm3742_vm8 = vcmp.lt.s32.totalorder (!%p4280_p5), %v5291_v11, 7 }
 0x8a3   : > { %v1398_v23 = vsel %vm610_vm3, %v1394_v21, -inf }
 0x8a4   : > { %1399 = vmax.xlane.f32.xlu1 %v1398_v23 }
 0x8b5   : > { %1419 = vrot.lane.b32.xlu1 %v5128_v13, %s4981_s18 }
 0x8b9   : > { %4721 = vrot.lane.b32.xlu1 %v4720_v63, %s4982_s19  ;;  %s1692_s19 = scalar_lea.vmem %s5712_s8, %s5095_s22 }
 0x8bd   : > { %4726 = vrot.lane.b32.xlu1 %v4725_v60, %s4983_s20  ;;  %s5320_s20 = scalar_lea.vmem %s5711_s7, %s4302_s26 }
 0x92d   : > { %v1397_v22 = vpop.xlane.xlu0 %1396 }
 0x92e   : > { %v1401_v24 = vsub.f32 %v1393_v12, %v1397_v22 }
 0x930   : > { %v1403_v25 = vmul.f32 1.442695, %v1401_v24 }
 0x931   : > { %v1400_v26 = vpop.xlane.xlu1 %1399 }
 0x932   : > { %4891 = vpow2.f32 %v1403_v25  ;;  %v1402_v27 = vsub.f32 %v1394_v21, %v1400_v26 }
 0x934   : > { %v1405_v29 = vmul.f32 1.442695, %v1402_v27 }
 0x935   : > { %v1420_v28 = vpop.permute.xlu1 %1419 }
 0x936   : > { %4893 = vpow2.f32 %v1405_v29  ;;  %v1425_v30 = vsel %vm751_vm4, %v1420_v28, 0 }
 0x937   : > { %4625 = vmatpush3.bf16.msra.mxu1 %v1425_v30 }
 0x938   : > { %4636 = vmatprep.subr.bf16.mxu1 %v4969_v2 }
 0x939   : > { %v4722_v51 = vpop.permute.xlu1 %4721 }
 0x93a   : > { %v4724_v53 = vunpack.i.h.bf16 %v4722_v51  ;;  %v4723_v54 = vunpack.i.l.bf16 %v4722_v51 }
 0x93c   : > { %v4892_v13 = vpop.eup %4891  ;;  %v1540_v57 = vsel %vm610_vm3, %v5192_v8, %v4724_v53  ;;  %v1539_v59 = vsel %vm610_vm3, %v5190_v1, %v4723_v54  ;;  %v5299_v1 = vsub.s32 0, %v5291_v11  ;;  %v5302_v8 = vld [vmem:[%s5296_s25] sm:$0x3f]  ;;  %v5343_v54 = vsub.s32 1, %v5291_v11 }
 0x93d   : > { %v1407_v58 = vsel %vm610_vm3, %v4892_v13, 0.0  ;;  %v4727_v52 = vpop.permute.xlu1 %4726 }
 0x93e   : > { %1408 = vadd.xlane.f32.xlu0 %v1407_v58  ;;  %v4729_v55 = vunpack.i.h.bf16 %v4727_v52  ;;  %v1557_v12 = vrot.slane %v5302_v8, %v5299_v1 }
 0x940   : > { %v4894_v62 = vpop.eup %4893  ;;  %v1543_v3 = vsel %vm1541_vm5, %v1540_v57, %v4729_v55 }
 0x941   : > { %v1410_v63 = vsel %vm610_vm3, %v4894_v62, 0.0 }
 0x942   : > { %1411 = vadd.xlane.f32.xlu0 %v1410_v63  ;;  %v1667_v63 = vld [vmem:[%s5320_s20 + $0x40] sm:$0xff] }
 0x958   : > { %1467 = vrot.lane.b32.xlu0 %v5131_v16, %s4981_s18 }
 0x9cb   : > { %v1409_v31 = vpop.xlane.xlu0 %1408 }
 0x9cc   : > { %4895 = vrcp.f32 %v1409_v31  ;;  %v1660_v31 = vld [vmem:[%s5320_s20 + $0x8] sm:$0xff] }
 0x9cf   : > { %v1412_v32 = vpop.xlane.xlu0 %1411 }
 0x9d0   : > { %4897 = vrcp.f32 %v1412_v32 }
 0x9d3   : > { %v1468_v33 = vpop.permute.xlu0 %1467 }
 0x9d4   : > { %v1473_v34 = vsel %vm751_vm4, %v1468_v33, 0  ;;  %v1668_v33 = vld [vmem:[%s5320_s20 + $0x48] sm:$0xff] }
 0x9d5   : > { %4631 = vmatpush3.bf16.msra.mxu0 %v1473_v34 }
 0x9d6   : > { %v4896_v35 = vpop.eup %4895 }
 0x9d7   : > { %v1415_v36 = vmul.f32 %v4896_v35, %v4892_v13  ;;  %v4112_v35 = vcombine.low %v1660_v31, %v1668_v33 }
 0x9d9   : > { %v1417_v37 = vpack.c.bf16 %v1415_v36, %v1415_v36  ;;  %v4113_v36 = vcombine.high %v1660_v31, %v1668_v33  ;;  %v1665_v33 = vld [vmem:[%s5320_s20 + $0x30] sm:$0xff] }
 0x9da   : > { %v4898_v38 = vpop.eup %4897 }
 0x9db   : > { %v1416_v39 = vmul.f32 %v4898_v38, %v4894_v62  ;;  %4627 = vmatmul.mubr.msk.bf16.vlgmr.msra.gmra.mrb[28].mxu1 %vm610_vm3, %v1417_v37  ;;  %v1659_v62 = vld [vmem:[%s5320_s20] sm:$0xff] }
 0x9dc   : > { %4640 = vmatprep.mubr.msk.bf16.mxu1 %vm4970_vm1, %v4969_v2  ;;  %4637 = vmatpush3.bf16.msra.mxu1 %v4737_v40  ;;  %v4111_v32 = vcombine.high %v1659_v62, %v1667_v63  ;;  %v4110_v34 = vcombine.low %v1659_v62, %v1667_v63  ;;  %v1675_v37 = vld [vmem:[%s5320_s20 + $0x80] sm:$0xff]  ;;  %v1684_v40 = vld [vmem:[%s5320_s20 + $0xc8] sm:$0xff] }
 0x9dd   : > { %v1418_v16 = vpack.c.bf16 %v1416_v39, %v1416_v39  ;;  %4638 = vmatprep.subr.bf16.mxu1 %v4969_v2  ;;  %v4728_v2 = vunpack.i.l.bf16 %v4727_v52  ;;  %v1683_v38 = vld [vmem:[%s5320_s20 + $0xc0] sm:$0xff]  ;;  %v1676_v39 = vld [vmem:[%s5320_s20 + $0x88] sm:$0xff] }
 0x9de   : > { %1940 = vmatprep.subr.bf16.mxu0 %v4111_v32 }
 0x9df   : > { %4633 = vmatmul.mubr.msk.bf16.vlgmr.msra.gmra.mrb[32].mxu0 %vm610_vm3, %v1418_v16  ;;  %v1542_v0 = vsel %vm1541_vm5, %v1539_v59, %v4728_v2  ;;  %v4127_v16 = vcombine.high %v1675_v37, %v1683_v38 }
 0x9e0   : > { %4639 = vmatpush3.bf16.msra.mxu1 %v4738_v41  ;;  %1941 = vmatpush1.bf16.msra.mxu0 %v4110_v34  ;;  %v4126_v41 = vcombine.low %v1675_v37, %v1683_v38  ;;  %v1673_v34 = vld [vmem:[%s5320_s20 + $0x70] sm:$0xff] }
 0x9e1   : > { %1983 = vmatprep.subr.bf16.mxu1 %v4113_v36  ;;  %1942 = vmatprep.subr.bf16.mxu0 %v4127_v16  ;;  %v1674_v36 = vld [vmem:[%s5320_s20 + $0x78] sm:$0xff] }
 0x9e4   : > { %1943 = vmatpush1.bf16.msra.mxu0 %v4126_v41  ;;  %v1689_v41 = vld [vmem:[%s5320_s20 + $0xf0] sm:$0xff] }
 0xaae   : > { %v1461_v42 = vpop.f32.mrb[28].mxu1 }
 0xaaf   : > { %v4628_v43 = vpop.f32.mrb[29].mxu1 }
 0xab0   : > { %v1464_v44 = vpop.f32.mrb[30].mxu1  ;;  %v4129_v43 = vcombine.high %v1676_v39, %v1684_v40 }
 0xab1   : > { %v4629_v45 = vpop.f32.mrb[31].mxu1  ;;  %v1661_v44 = vld [vmem:[%s5320_s20 + $0x10] sm:$0xff] }
 0xab2   : > { %v1509_v46 = vpop.f32.mrb[32].mxu0  ;;  %v1669_v45 = vld [vmem:[%s5320_s20 + $0x50] sm:$0xff] }
 0xab3   : > { %v4730_v47 = vpack.i.bf16 %v1509_v46, %v1461_v42  ;;  %v4634_v48 = vpop.f32.mrb[33].mxu0  ;;  %v4128_v42 = vcombine.low %v1676_v39, %v1684_v40  ;;  %v1662_v46 = vld [vmem:[%s5320_s20 + $0x18] sm:$0xff]  ;;  %v4123_v39 = vcombine.high %v1665_v33, %v1673_v34  ;;  %v1681_v40 = vld [vmem:[%s5320_s20 + $0xb0] sm:$0xff] }
 0xab4   : > { %v1512_v49 = vpop.f32.mrb[34].mxu0  ;;  %v4115_v48 = vcombine.high %v1661_v44, %v1669_v45 }
 0xab5   : > { %4731 = vrot.lane.b32.xlu0 %v4730_v47, %s4984_s21  ;;  %v4635_v50 = vpop.f32.mrb[35].mxu0  ;;  %v4985_v47 = vmov 0   ;;  %v1670_v49 = vld [vmem:[%s5320_s20 + $0x58] sm:$0xff]  ;;  %s4303_s21 = sshll.u32 %s4959_s29, 10 }
 0xab6   : > { %1972 = vmatprep.mubr.bf16.mxu0 %v4985_v47  ;;  %v4114_v50 = vcombine.low %v1661_v44, %v1669_v45  ;;  %v4116_v51 = vcombine.low %v1662_v46, %v1670_v49  ;;  %v4117_v52 = vcombine.high %v1662_v46, %v1670_v49  ;;  %2026 = vmatprep.subr.bf16.mxu0 %v4115_v48  ;;  %s5340_s24 = scalar_lea.vmem %s5713_s9, %s4303_s21 }
 0xab7   : > { %v4122_v44 = vcombine.low %v1665_v33, %v1673_v34  ;;  %v4139_v46 = vcombine.high %v1681_v40, %v1689_v41  ;;  %v4138_v49 = vcombine.low %v1681_v40, %v1689_v41  ;;  %v5455_v33 = vsub.s32 3, %v5291_v11 }
 0xab8   : > { %v1727_v40 = vsub.s32 7, %v5291_v11 }
 0xb27   : > { %v4732_v56 = vpop.permute.xlu0 %4731 }
 0xb28   : > { %v4734_v60 = vunpack.i.h.bf16 %v4732_v56  ;;  %v4733_v61 = vunpack.i.l.bf16 %v4732_v56  ;;  %v5346_v56 = vsub.s32 2, %v5291_v11 }
 0xb2a   : > { %v1546_v6 = vsel %vm1544_vm6, %v1543_v3, %v4734_v60  ;;  %v1545_v7 = vsel %vm1544_vm6, %v1542_v0, %v4733_v61  ;;  %v1646_v61 = vrot.slane %v5302_v8, %v5343_v54 }
 0xb2b   : > { %v1547_v9 = vpack.c.bf16 %v1546_v6, %v1545_v7  ;;  %v1652_v7 = vrot.slane %v5302_v8, %v5346_v56 }
 0xb2d   : > { %4641 = vmatmul.mubr.msk.bf16.vlgmr.msra.gmra.mrb[32].mxu1 %vm560_vm2, %v1547_v9 }
 0xb2e   : > { %1984 = vmatpush1.bf16.msra.mxu1 %v4112_v35  ;;  %2015 = vmatprep.mubr.bf16.mxu1 %v4985_v47  ;;  %v1666_v35 = vld [vmem:[%s5320_s20 + $0x38] sm:$0xff] }
 0xb2f   : > { %1985 = vmatprep.subr.bf16.mxu1 %v4129_v43  ;;  %v4125_v16 = vcombine.high %v1666_v35, %v1674_v36  ;;  %v1690_v43 = vld [vmem:[%s5320_s20 + $0xf8] sm:$0xff]  ;;  %v4124_v45 = vcombine.low %v1666_v35, %v1674_v36 }
 0xb32   : > { %1986 = vmatpush1.bf16.msra.mxu1 %v4128_v42  ;;  %v1682_v42 = vld [vmem:[%s5320_s20 + $0xb8] sm:$0xff] }
 0xb33   : > { %2069 = vmatprep.subr.bf16.mxu1 %v4117_v52  ;;  %v4141_v48 = vcombine.high %v1682_v42, %v1690_v43  ;;  %v4740_v52 = vld [vmem:[%s5340_s24 + $0xc0] sm:$0xff]  }
 0xc00   : > { %v1607_v14 = vpop.f32.mrb[32].mxu1 }
 0xc01   : > { %v1608_v15 = vadd.f32 %v1607_v14, %v1557_v12  ;;  %v4642_v17 = vpop.f32.mrb[33].mxu1  ;;  %v1677_v14 = vld [vmem:[%s5320_s20 + $0x90] sm:$0xff] }
 0xc02   : > { %v1610_v18 = vpop.f32.mrb[34].mxu1  ;;  %v1678_v17 = vld [vmem:[%s5320_s20 + $0x98] sm:$0xff] }
 0xc03   : > { %v1611_v19 = vadd.f32 %v1610_v18, %v1557_v12  ;;  %v4643_v20 = vpop.f32.mrb[35].mxu1  ;;  %v1614_v21 = vadd.f32 %v1608_v15, %v5113_v4  ;;  %v1685_v15 = vld [vmem:[%s5320_s20 + $0xd0] sm:$0xff]  ;;  %v1686_v18 = vld [vmem:[%s5320_s20 + $0xd8] sm:$0xff] }
 0xc04   : > { %v4133_v8 = vcombine.high %v1678_v17, %v1686_v18 }
 0xc05   : > { %v1616_v23 = vsel %vm560_vm2, %v1614_v21, 0.0  ;;  %v1615_v22 = vadd.f32 %v1611_v19, %v5115_v5 }
 0xc06   : > { %1617 = vadd.xlane.f32.xlu1 %v1616_v23  ;;  %v4131_v23 = vcombine.high %v1677_v14, %v1685_v15 }
 0xc07   : > { %v1619_v24 = vsel %vm560_vm2, %v1615_v22, 0.0 }
 0xc08   : > { %1620 = vadd.xlane.f32.xlu0 %v1619_v24  ;;  %v1671_v24 = vld [vmem:[%s5320_s20 + $0x60] sm:$0xff] }
 0xc93   : > { %v1618_v25 = vpop.xlane.xlu1 %1617 }
 0xc94   : > { %v1623_v26 = vmul.f32 0.03125, %v1618_v25  ;;  %v1664_v25 = vld [vmem:[%s5320_s20 + $0x28] sm:$0xff] }
 0xc95   : > { %v1621_v27 = vpop.xlane.xlu0 %1620 }
 0xc96   : > { %v1625_v29 = vsub.f32 %v1614_v21, %v1623_v26  ;;  %v1624_v28 = vmul.f32 0.03125, %v1621_v27  ;;  %v1672_v26 = vld [vmem:[%s5320_s20 + $0x68] sm:$0xff]  ;;  %v4130_v27 = vcombine.low %v1677_v14, %v1685_v15  ;;  %v4756_v14 = vld [vmem:[%s5340_s24 + $0xe0] sm:$0xff]  }
 0xc97   : > { %v4120_v63 = vcombine.low %v1664_v25, %v1672_v26  ;;  %v4757_v15 = vld [vmem:[%s5340_s24 + $0x20] sm:$0xff]  }
 0xc98   : > { %v5310_v30 = vsub.f32 %v1615_v22, %v1624_v28  ;;  %v1627_v13 = vmul.f32 %v1625_v29, %v1625_v29  ;;  %v1663_v22 = vld [vmem:[%s5320_s20 + $0x20] sm:$0xff] }
 0xc99   : > { %v4119_v28 = vcombine.high %v1663_v22, %v1671_v24  ;;  %v4118_v62 = vcombine.low %v1663_v22, %v1671_v24  ;;  %v4763_v22 = vld [vmem:[%s5340_s24 + $0x70] sm:$0xff]  }
 0xc9a   : > { %v1629_v58 = vsel %vm560_vm2, %v1627_v13, 0.0  ;;  %v1628_v4 = vmul.f32 %v5310_v30, %v5310_v30  ;;  %v1679_v13 = vld [vmem:[%s5320_s20 + $0xa0] sm:$0xff]  ;;  %v4764_v24 = vld [vmem:[%s5340_s24 + $0xf0] sm:$0xff]  }
 0xc9b   : > { %1630 = vadd.xlane.f32.xlu0 %v1629_v58  ;;  %v1687_v58 = vld [vmem:[%s5320_s20 + $0xe0] sm:$0xff] }
 0xc9c   : > { %v1632_v5 = vsel %vm560_vm2, %v1628_v4, 0.0  ;;  %v1680_v4 = vld [vmem:[%s5320_s20 + $0xa8] sm:$0xff]  ;;  %v4135_v31 = vcombine.high %v1679_v13, %v1687_v58  ;;  %v4134_v37 = vcombine.low %v1679_v13, %v1687_v58  ;;  %v4771_v13 = vld [vmem:[%s5340_s24 + $0x140] sm:$0xff]  }
 0xc9d   : > { %1633 = vadd.xlane.f32.xlu1 %v1632_v5  ;;  %v1688_v5 = vld [vmem:[%s5320_s20 + $0xe8] sm:$0xff]  ;;  %v4772_v58 = vld [vmem:[%s5340_s24 + $0x1c0] sm:$0xff]  }
 0xc9e   : > { %v4137_v32 = vcombine.high %v1680_v4, %v1688_v5  ;;  %v4136_v38 = vcombine.low %v1680_v4, %v1688_v5  ;;  %v5442_v4 = vsub.s32 4, %v5291_v11  ;;  %v1723_v5 = vsub.s32 6, %v5291_v11 }
 0xd28   : > { %v1631_v53 = vpop.xlane.xlu0 %1630 }
 0xd29   : > { %v1635_v55 = vmul.f32 0.03125, %v1631_v53  ;;  %v4741_v53 = vld [vmem:[%s5340_s24] sm:$0xff]  }
 0xd2a   : > { %v1634_v2 = vpop.xlane.xlu1 %1633 }
 0xd2b   : > { %v1637_v57 = vadd.f32 1e-05, %v1635_v55  ;;  %v1636_v59 = vmul.f32 0.03125, %v1634_v2  ;;  %v4742_v55 = vld [vmem:[%s5340_s24 + $0x80] sm:$0xff]   ;;  %v4743_v2 = vld [vmem:[%s5340_s24 + $0x48] sm:$0xff]  }
 0xd2d   : > { %4899 = vrsqrt.f32 %v1637_v57  ;;  %v1638_v60 = vadd.f32 1e-05, %v1636_v59  ;;  %v4744_v57 = vld [vmem:[%s5340_s24 + $0xc8] sm:$0xff]  }
 0xd2e   : > { %v4746_v59 = vld [vmem:[%s5340_s24 + $0x88] sm:$0xff]  }
 0xd2f   : > { %4901 = vrsqrt.f32 %v1638_v60  ;;  %v4747_v60 = vld [vmem:[%s5340_s24 + $0x50] sm:$0xff]  }
 0xd37   : > { %v4900_v0 = vpop.eup %4899 }
 0xd38   : > { %v1641_v3 = vmul.f32 %v4900_v0, %v1625_v29  ;;  %v4132_v29 = vcombine.low %v1678_v17, %v1686_v18  ;;  %v4749_v0 = vld [vmem:[%s5340_s24 + $0x10] sm:$0xff]   ;;  %v4758_v17 = vld [vmem:[%s5340_s24 + $0xa0] sm:$0xff]   ;;  %v4759_v18 = vld [vmem:[%s5340_s24 + $0x68] sm:$0xff]  }
 0xd39   : > { %v4902_v6 = vpop.eup %4901 }
 0xd3a   : > { %v1647_v9 = vmul.f32 %v1646_v61, %v1641_v3  ;;  %v1642_v10 = vmul.f32 %v4902_v6, %v5310_v30  ;;  %v4121_v30 = vcombine.high %v1664_v25, %v1672_v26  ;;  %v4750_v3 = vld [vmem:[%s5340_s24 + $0x90] sm:$0xff]   ;;  %v4751_v6 = vld [vmem:[%s5340_s24 + $0x58] sm:$0xff]  }
 0xd3b   : > { %v4765_v25 = vld [vmem:[%s5340_s24 + $0x30] sm:$0xff]  }
 0xd3c   : > { %v1648_v12 = vmul.f32 %v1646_v61, %v1642_v10  ;;  %v5357_v19 = vadd.f32 %v1652_v7, %v1647_v9  ;;  %v4748_v61 = vld [vmem:[%s5340_s24 + $0xd0] sm:$0xff]   ;;  %v4753_v9 = vld [vmem:[%s5340_s24 + $0x18] sm:$0xff]  }
 0xd3d   : > { %v4754_v10 = vld [vmem:[%s5340_s24 + $0x98] sm:$0xff]   ;;  %v4766_v26 = vld [vmem:[%s5340_s24 + $0xb0] sm:$0xff]  }
 0xd3e   : > { %v5359_v20 = vadd.f32 %v1652_v7, %v1648_v12  ;;  %v4752_v7 = vld [vmem:[%s5340_s24 + $0xd8] sm:$0xff]   ;;  %v4755_v12 = vld [vmem:[%s5340_s24 + $0x60] sm:$0xff]  }
 0xd40   : > { %v5363_v21 = vpack.c.bf16 %v5359_v20, %v5357_v19 }
 0xd42   : > { %4142 = vmatmul.mubr.msk.bf16.vlgmr.msra.gmra.mrb[36].mxu0 %vm560_vm2, %v5363_v21  ;;  %4143 = vmatmul.mubr.msk.bf16.vlgmr.msra.gmra.mrb[36].mxu1 %vm560_vm2, %v5363_v21 }
 0xd43   : > { %2027 = vmatpush1.bf16.msra.mxu0 %v4114_v50  ;;  %2070 = vmatpush1.bf16.msra.mxu1 %v4116_v51  ;;  %v4140_v50 = vcombine.low %v1682_v42, %v1690_v43  ;;  %v4739_v51 = vld [vmem:[%s5340_s24 + $0x40] sm:$0xff]  }
 0xd44   : > { %2028 = vmatprep.subr.bf16.mxu0 %v4131_v23  ;;  %2071 = vmatprep.subr.bf16.mxu1 %v4133_v8  ;;  %v4761_v23 = vld [vmem:[%s5340_s24 + $0x28] sm:$0xff]  }
 0xd45   : > { %2058 = vmatprep.mubr.bf16.mxu0 %v4985_v47  ;;  %2101 = vmatprep.mubr.bf16.mxu1 %v4985_v47  ;;  %v4762_v8 = vld [vmem:[%s5340_s24 + $0xa8] sm:$0xff]  }
 0xd47   : > { %2029 = vmatpush1.bf16.msra.mxu0 %v4130_v27  ;;  %2072 = vmatpush1.bf16.msra.mxu1 %v4132_v29  ;;  %v4767_v27 = vld [vmem:[%s5340_s24 + $0x78] sm:$0xff]  }
 0xd48   : > { %2112 = vmatprep.subr.bf16.mxu0 %v4119_v28  ;;  %2155 = vmatprep.subr.bf16.mxu1 %v4121_v30  ;;  %v4768_v29 = vld [vmem:[%s5340_s24 + $0xf8] sm:$0xff]  }
 0xd49   : > { %v4769_v28 = vld [vmem:[%s5340_s24 + $0x38] sm:$0xff]  }
 0xd4a   : > { %4144 = vmatmul.mubr.msk.bf16.vlgmr.msra.gmra.mrb[40].mxu0 %vm560_vm2, %v5363_v21  ;;  %4145 = vmatmul.mubr.msk.bf16.vlgmr.msra.gmra.mrb[40].mxu1 %vm560_vm2, %v5363_v21  ;;  %v4770_v30 = vld [vmem:[%s5340_s24 + $0xb8] sm:$0xff]  }
 0xd4b   : > { %2113 = vmatpush1.bf16.msra.mxu0 %v4118_v62  ;;  %2156 = vmatpush1.bf16.msra.mxu1 %v4120_v63  ;;  %v5445_v62 = vld [vmem:[%s1692_s19 + $0x8] sm:$0xff] }
 0xd4c   : > { %2114 = vmatprep.subr.bf16.mxu0 %v4135_v31  ;;  %2157 = vmatprep.subr.bf16.mxu1 %v4137_v32  ;;  %v5449_v63 = vrot.slane %v5445_v62, %v5442_v4  ;;  %v5452_v31 = vrot.slane %v5445_v62, %v1723_v5  ;;  %v1693_v32 = vld [vmem:[%s1692_s19] sm:$0xff] }
 0xd4d   : > { %2144 = vmatprep.mubr.bf16.mxu0 %v4985_v47  ;;  %2187 = vmatprep.mubr.bf16.mxu1 %v4985_v47  ;;  %v1700_v34 = vrot.slane %v1693_v32, %v5299_v1  ;;  %v1708_v35 = vrot.slane %v1693_v32, %v5346_v56  ;;  %v1704_v36 = vrot.slane %v1693_v32, %v5343_v54 }
 0xd4f   : > { %2115 = vmatpush1.bf16.msra.mxu0 %v4134_v37  ;;  %2158 = vmatpush1.bf16.msra.mxu1 %v4136_v38  ;;  %v1712_v37 = vrot.slane %v1693_v32, %v5455_v33 }
 0xd50   : > { %2198 = vmatprep.subr.bf16.mxu0 %v4123_v39  ;;  %2241 = vmatprep.subr.bf16.mxu1 %v4125_v16  ;;  %v5462_v16 = vsub.s32 5, %v5291_v11  ;;  %v4914_v11 = vld [vmem:[%s5716_s12 + $0x8] sm:$0xff] (!%p4280_p5)  }
 0xd52   : > { %4146 = vmatmul.mubr.msk.bf16.vlgmr.msra.gmra.mrb[44].mxu0 %vm560_vm2, %v5363_v21  ;;  %4147 = vmatmul.mubr.msk.bf16.vlgmr.msra.gmra.mrb[44].mxu1 %vm560_vm2, %v5363_v21 }
 0xd53   : > { %2199 = vmatpush1.bf16.msra.mxu0 %v4122_v44  ;;  %2242 = vmatpush1.bf16.msra.mxu1 %v4124_v45 }
 0xd54   : > { %2200 = vmatprep.subr.bf16.mxu0 %v4139_v46  ;;  %2243 = vmatprep.subr.bf16.mxu1 %v4141_v48 }
 0xd55   : > { %2230 = vmatprep.mubr.bf16.mxu0 %v4985_v47  ;;  %2273 = vmatprep.mubr.bf16.mxu1 %v4985_v47  ;;  %v4745_v47 = vld [vmem:[%s5340_s24 + $0x8] sm:$0xff]  }
 0xd57   : > { %2201 = vmatpush1.bf16.msra.mxu0 %v4138_v49  ;;  %2244 = vmatpush1.bf16.msra.mxu1 %v4140_v50 }
 0xd58   : > { %4347 = vmatprep.subr.bf16.mxu0 %v4739_v51  ;;  %4369 = vmatprep.subr.bf16.mxu1 %v4740_v52 }
 0xd5a   : > { %4148 = vmatmul.mubr.msk.bf16.vlgmr.msra.gmra.mrb[48].mxu0 %vm560_vm2, %v5363_v21  ;;  %4149 = vmatmul.mubr.msk.bf16.vlgmr.msra.gmra.mrb[48].mxu1 %vm560_vm2, %v5363_v21  ;;  %v4760_v21 = vld [vmem:[%s5340_s24 + $0xe8] sm:$0xff]  }
 0xd5b   : > { %4348 = vmatpush3.bf16.msra.mxu0 %v4741_v53  ;;  %4370 = vmatpush3.bf16.msra.mxu1 %v4742_v55  ;;  %v1716_v55 = vrot.slane %v1693_v32, %v5442_v4 }
 0xd5c   : > { %4349 = vmatprep.subr.bf16.mxu0 %v4743_v2  ;;  %4371 = vmatprep.subr.bf16.mxu1 %v4744_v57  ;;  %v1724_v2 = vrot.slane %v1693_v32, %v1723_v5 }
 0xd5f   : > { %4350 = vmatpush3.bf16.msra.mxu0 %v4745_v47  ;;  %4372 = vmatpush3.bf16.msra.mxu1 %v4746_v59  ;;  %v1720_v59 = vrot.slane %v1693_v32, %v5462_v16 }
 0xd60   : > { %4351 = vmatprep.subr.bf16.mxu0 %v4747_v60  ;;  %4373 = vmatprep.subr.bf16.mxu1 %v4748_v61  ;;  %v1728_v60 = vrot.slane %v1693_v32, %v1727_v40 }
 0xd63   : > { %4352 = vmatpush3.bf16.msra.mxu0 %v4749_v0  ;;  %4374 = vmatpush3.bf16.msra.mxu1 %v4750_v3 }
 0xd64   : > { %4353 = vmatprep.subr.bf16.mxu0 %v4751_v6  ;;  %4375 = vmatprep.subr.bf16.mxu1 %v4752_v7 }
 0xd67   : > { %4354 = vmatpush3.bf16.msra.mxu0 %v4753_v9  ;;  %4376 = vmatpush3.bf16.msra.mxu1 %v4754_v10 }
 0xd68   : > { %4355 = vmatprep.subr.bf16.mxu0 %v4755_v12  ;;  %4377 = vmatprep.subr.bf16.mxu1 %v4756_v14 }
 0xd6b   : > { %4356 = vmatpush3.bf16.msra.mxu0 %v4757_v15  ;;  %4378 = vmatpush3.bf16.msra.mxu1 %v4758_v17 }
 0xd6c   : > { %4357 = vmatprep.subr.bf16.mxu0 %v4759_v18  ;;  %4379 = vmatprep.subr.bf16.mxu1 %v4760_v21 }
 0xd6f   : > { %4358 = vmatpush3.bf16.msra.mxu0 %v4761_v23  ;;  %4380 = vmatpush3.bf16.msra.mxu1 %v4762_v8  ;;  %v4773_v8 = vld [vmem:[%s5340_s24 + $0x100] sm:$0xff]  }
 0xd70   : > { %4359 = vmatprep.subr.bf16.mxu0 %v4763_v22  ;;  %4381 = vmatprep.subr.bf16.mxu1 %v4764_v24  ;;  %v4774_v22 = vld [vmem:[%s5340_s24 + $0x180] sm:$0xff]  }
 0xd73   : > { %4360 = vmatpush3.bf16.msra.mxu0 %v4765_v25  ;;  %4382 = vmatpush3.bf16.msra.mxu1 %v4766_v26 }
 0xd74   : > { %4361 = vmatprep.subr.bf16.mxu0 %v4767_v27  ;;  %4383 = vmatprep.subr.bf16.mxu1 %v4768_v29  ;;  %v4775_v29 = vld [vmem:[%s5340_s24 + $0x148] sm:$0xff]  }
 0xd77   : > { %4362 = vmatpush3.bf16.msra.mxu0 %v4769_v28  ;;  %4384 = vmatpush3.bf16.msra.mxu1 %v4770_v30  ;;  %v4776_v28 = vld [vmem:[%s5340_s24 + $0x1c8] sm:$0xff]   ;;  %v1732_v30 = vrot.slane %v5445_v62, %v5299_v1  ;;  %v1736_v1 = vrot.slane %v5445_v62, %v5343_v54 }
 0xd78   : > { %4391 = vmatprep.subr.bf16.mxu0 %v4771_v13  ;;  %4413 = vmatprep.subr.bf16.mxu1 %v4772_v58 }
 0xe15   : > { %v1974_v38 = vpop.f32.mrb[36].mxu0  ;;  %v2017_v39 = vpop.f32.mrb[36].mxu1 }
 0xe16   : > { %v1975_v41 = vadd.f32 %v1974_v38, %v1700_v34  ;;  %v2018_v42 = vadd.f32 %v2017_v39, %v1708_v35  ;;  %v1976_v43 = vpop.f32.mrb[37].mxu0  ;;  %v2019_v44 = vpop.f32.mrb[37].mxu1 }
 0xe17   : > { %v1977_v45 = vadd.f32 %v1976_v43, %v1704_v36  ;;  %v2020_v46 = vadd.f32 %v2019_v44, %v1712_v37  ;;  %v1978_v48 = vpop.f32.mrb[38].mxu0  ;;  %v2021_v49 = vpop.f32.mrb[38].mxu1  ;;  %v4778_v43 = vld [vmem:[%s5340_s24 + $0x188] sm:$0xff]  }
 0xe18   : > { %v1979_v50 = vadd.f32 %v1978_v48, %v1700_v34  ;;  %v2022_v51 = vadd.f32 %v2021_v49, %v1708_v35  ;;  %v1980_v52 = vpop.f32.mrb[39].mxu0  ;;  %v2023_v53 = vpop.f32.mrb[39].mxu1  ;;  %v2284_v61 = vmax.f32 %v1975_v41, 0.0  ;;  %v2286_v0 = vmax.f32 %v2018_v42, 0.0  ;;  %v4777_v42 = vld [vmem:[%s5340_s24 + $0x108] sm:$0xff]   ;;  %v4779_v49 = vld [vmem:[%s5340_s24 + $0x150] sm:$0xff]  }
 0xe19   : > { %v1981_v57 = vadd.f32 %v1980_v52, %v1704_v36  ;;  %v2024_v47 = vadd.f32 %v2023_v53, %v1712_v37  ;;  %v2285_v7 = vmax.f32 %v1977_v45, 0.0  ;;  %v2287_v9 = vmax.f32 %v2020_v46, 0.0 }
 0xe1a   : > { %v2300_v3 = vmax.f32 %v1979_v50, 0.0  ;;  %v2302_v6 = vmax.f32 %v2022_v51, 0.0  ;;  %v1740_v34 = vrot.slane %v5445_v62, %v5346_v56  ;;  %v1744_v56 = vrot.slane %v5445_v62, %v5455_v33  ;;  %v4780_v50 = vld [vmem:[%s5340_s24 + $0x1d0] sm:$0xff]  }
 0xe1b   : > { %v2301_v10 = vmax.f32 %v1981_v57, 0.0  ;;  %v2303_v12 = vmax.f32 %v2024_v47, 0.0 }
 0xe1c   : > { %v2316_v14 = vpack.c.bf16 %v2300_v3, %v2284_v61  ;;  %v2318_v15 = vpack.c.bf16 %v2302_v6, %v2286_v0  ;;  %v4781_v61 = vld [vmem:[%s5340_s24 + $0x110] sm:$0xff]  }
 0xe1d   : > { %v2317_v17 = vpack.c.bf16 %v2301_v10, %v2285_v7  ;;  %v2319_v18 = vpack.c.bf16 %v2303_v12, %v2287_v9  ;;  %v2060_v21 = vpop.f32.mrb[40].mxu0  ;;  %v2103_v23 = vpop.f32.mrb[40].mxu1  ;;  %v4782_v0 = vld [vmem:[%s5340_s24 + $0x190] sm:$0xff]   ;;  %v4783_v10 = vld [vmem:[%s5340_s24 + $0x158] sm:$0xff]  }
 0xe1e   : > { %v2061_v24 = vadd.f32 %v2060_v21, %v1716_v55  ;;  %v2104_v25 = vadd.f32 %v2103_v23, %v1724_v2  ;;  %v2062_v26 = vpop.f32.mrb[41].mxu0  ;;  %v2105_v27 = vpop.f32.mrb[41].mxu1  ;;  %v4784_v12 = vld [vmem:[%s5340_s24 + $0x1d8] sm:$0xff]  }
 0xe1f   : > { %v2063_v13 = vadd.f32 %v2062_v26, %v1720_v59  ;;  %v2106_v58 = vadd.f32 %v2105_v27, %v1728_v60  ;;  %v2064_v5 = vpop.f32.mrb[42].mxu0  ;;  %v2107_v32 = vpop.f32.mrb[42].mxu1  ;;  %3395 = vmatprep.mubr.bf16.mxu0 %v2317_v17  ;;  %3436 = vmatprep.mubr.bf16.mxu1 %v2319_v18  ;;  %v4785_v27 = vld [vmem:[%s5340_s24 + $0x118] sm:$0xff]  }
 0xe20   : > { %v2065_v35 = vadd.f32 %v2064_v5, %v1716_v55  ;;  %v2108_v36 = vadd.f32 %v2107_v32, %v1724_v2  ;;  %v2066_v37 = vpop.f32.mrb[43].mxu0  ;;  %v2109_v38 = vpop.f32.mrb[43].mxu1  ;;  %3396 = vmatmul.mubr.bf16.vlgmr.msra.gmra.mrb[52].mxu0 %v2316_v14  ;;  %3437 = vmatmul.mubr.bf16.vlgmr.msra.gmra.mrb[52].mxu1 %v2318_v15  ;;  %v2288_v44 = vmax.f32 %v2061_v24, 0.0  ;;  %v2290_v45 = vmax.f32 %v2104_v25, 0.0  ;;  %v4787_v32 = vld [vmem:[%s5340_s24 + $0x160] sm:$0xff]  }
 0xe21   : > { %v2067_v39 = vadd.f32 %v2066_v37, %v1720_v59  ;;  %v2110_v41 = vadd.f32 %v2109_v38, %v1728_v60  ;;  %4392 = vmatpush3.bf16.msra.mxu0 %v4773_v8  ;;  %4414 = vmatpush3.bf16.msra.mxu1 %v4774_v22  ;;  %v2289_v54 = vmax.f32 %v2063_v13, 0.0  ;;  %v2291_v51 = vmax.f32 %v2106_v58, 0.0 }
 0xe22   : > { %v2304_v46 = vmax.f32 %v2065_v35, 0.0  ;;  %v2306_v48 = vmax.f32 %v2108_v36, 0.0  ;;  %4393 = vmatprep.subr.bf16.mxu0 %v4775_v29  ;;  %4415 = vmatprep.subr.bf16.mxu1 %v4776_v28  ;;  %v1752_v24 = vrot.slane %v5445_v62, %v5462_v16  ;;  %v4786_v29 = vld [vmem:[%s5340_s24 + $0x198] sm:$0xff]   ;;  %v1760_v28 = vrot.slane %v5445_v62, %v1727_v40 }
 0xe23   : > { %v2305_v52 = vmax.f32 %v2067_v39, 0.0  ;;  %v2307_v53 = vmax.f32 %v2110_v41, 0.0 }
 0xe24   : > { %v5485_v55 = vpack.c.bf16 %v2304_v46, %v2288_v44  ;;  %v5487_v2 = vpack.c.bf16 %v2306_v48, %v2290_v45 }
 0xe25   : > { %v2321_v57 = vpack.c.bf16 %v2305_v52, %v2289_v54  ;;  %v2323_v47 = vpack.c.bf16 %v2307_v53, %v2291_v51  ;;  %4394 = vmatpush3.bf16.msra.mxu0 %v4777_v42  ;;  %4416 = vmatpush3.bf16.msra.mxu1 %v4778_v43  ;;  %v2146_v59 = vpop.f32.mrb[44].mxu0  ;;  %v2189_v60 = vpop.f32.mrb[44].mxu1  ;;  %v4789_v43 = vld [vmem:[%s5340_s24 + $0x120] sm:$0xff]  }
 0xe26   : > { %v2147_v3 = vadd.f32 %v2146_v59, %v1732_v30  ;;  %v2190_v6 = vadd.f32 %v2189_v60, %v1740_v34  ;;  %v2148_v7 = vpop.f32.mrb[45].mxu0  ;;  %v2191_v9 = vpop.f32.mrb[45].mxu1  ;;  %4395 = vmatprep.subr.bf16.mxu0 %v4779_v49  ;;  %4417 = vmatprep.subr.bf16.mxu1 %v4780_v50  ;;  %v4791_v49 = vld [vmem:[%s5340_s24 + $0x168] sm:$0xff]  }
 0xe27   : > { %v2149_v14 = vadd.f32 %v2148_v7, %v1736_v1  ;;  %v2192_v15 = vadd.f32 %v2191_v9, %v1744_v56  ;;  %v2150_v17 = vpop.f32.mrb[46].mxu0  ;;  %v2193_v18 = vpop.f32.mrb[46].mxu1  ;;  %3477 = vmatprep.mubr.bf16.mxu0 %v2321_v57  ;;  %3518 = vmatprep.mubr.bf16.mxu1 %v2323_v47  ;;  %v4792_v50 = vld [vmem:[%s5340_s24 + $0x1e8] sm:$0xff]  }
 0xe28   : > { %v2151_v21 = vadd.f32 %v2150_v17, %v1732_v30  ;;  %v2194_v23 = vadd.f32 %v2193_v18, %v1740_v34  ;;  %v2152_v8 = vpop.f32.mrb[47].mxu0  ;;  %v2195_v22 = vpop.f32.mrb[47].mxu1  ;;  %v2292_v13 = vmax.f32 %v2147_v3, 0.0  ;;  %v2294_v30 = vmax.f32 %v2190_v6, 0.0  ;;  %v4788_v34 = vld [vmem:[%s5340_s24 + $0x1e0] sm:$0xff]   ;;  %v4793_v3 = vld [vmem:[%s5340_s24 + $0x128] sm:$0xff]  }
 0xe29   : > { %v2153_v25 = vadd.f32 %v2152_v8, %v1736_v1  ;;  %v2196_v26 = vadd.f32 %v2195_v22, %v1744_v56  ;;  %4396 = vmatpush3.bf16.msra.mxu0 %v4781_v61  ;;  %4418 = vmatpush3.bf16.msra.mxu1 %v4782_v0  ;;  %v2293_v35 = vmax.f32 %v2149_v14, 0.0  ;;  %v2295_v36 = vmax.f32 %v2192_v15, 0.0  ;;  %v4790_v56 = vld [vmem:[%s5340_s24 + $0x1a0] sm:$0xff]   ;;  %v4794_v6 = vld [vmem:[%s5340_s24 + $0x1a8] sm:$0xff]  }
 0xe2a   : > { %v2308_v58 = vmax.f32 %v2151_v21, 0.0  ;;  %v2310_v5 = vmax.f32 %v2194_v23, 0.0  ;;  %4397 = vmatprep.subr.bf16.mxu0 %v4783_v10  ;;  %4419 = vmatprep.subr.bf16.mxu1 %v4784_v12 }
 0xe2b   : > { %v2309_v37 = vmax.f32 %v2153_v25, 0.0  ;;  %v2311_v38 = vmax.f32 %v2196_v26, 0.0  ;;  %v4798_v25 = vld [vmem:[%s5340_s24 + $0x1b0] sm:$0xff]   ;;  %v4799_v26 = vld [vmem:[%s5340_s24 + $0x178] sm:$0xff]  }
 0xe2c   : > { %v5502_v1 = vpack.c.bf16 %v2308_v58, %v2292_v13  ;;  %v5504_v39 = vpack.c.bf16 %v2310_v5, %v2294_v30  ;;  %v4803_v13 = vld [vmem:[%s5340_s24 + $0x240] sm:$0xff]  }
 0xe2d   : > { %v5506_v62 = vpack.c.bf16 %v2309_v37, %v2293_v35  ;;  %v5508_v40 = vpack.c.bf16 %v2311_v38, %v2295_v36  ;;  %4398 = vmatpush3.bf16.msra.mxu0 %v4785_v27  ;;  %4420 = vmatpush3.bf16.msra.mxu1 %v4786_v29  ;;  %v2232_v41 = vpop.f32.mrb[48].mxu0  ;;  %v2275_v42 = vpop.f32.mrb[48].mxu1  ;;  %v4800_v27 = vld [vmem:[%s5340_s24 + $0x1f8] sm:$0xff]   ;;  %v4804_v30 = vld [vmem:[%s5340_s24 + $0x2c0] sm:$0xff]   ;;  %v4809_v35 = vld [vmem:[%s5340_s24 + $0x208] sm:$0xff]  }
 0xe2e   : > { %v2233_v44 = vadd.f32 %v2232_v41, %v5449_v63  ;;  %v2276_v45 = vadd.f32 %v2275_v42, %v5452_v31  ;;  %v2234_v46 = vpop.f32.mrb[49].mxu0  ;;  %v2277_v48 = vpop.f32.mrb[49].mxu1  ;;  %4399 = vmatprep.subr.bf16.mxu0 %v4787_v32  ;;  %4421 = vmatprep.subr.bf16.mxu1 %v4788_v34  ;;  %v4801_v29 = vld [vmem:[%s5340_s24 + $0x138] sm:$0xff]   ;;  %v4805_v58 = vld [vmem:[%s5340_s24 + $0x200] sm:$0xff]   ;;  %v4807_v32 = vld [vmem:[%s5340_s24 + $0x248] sm:$0xff]  }
 0xe2f   : > { %v2235_v54 = vadd.f32 %v2234_v46, %v1752_v24  ;;  %v2278_v51 = vadd.f32 %v2277_v48, %v1760_v28  ;;  %v2236_v52 = vpop.f32.mrb[50].mxu0  ;;  %v2279_v53 = vpop.f32.mrb[50].mxu1  ;;  %v4806_v5 = vld [vmem:[%s5340_s24 + $0x280] sm:$0xff]   ;;  %v4808_v34 = vld [vmem:[%s5340_s24 + $0x2c8] sm:$0xff]   ;;  %v4811_v37 = vld [vmem:[%s5340_s24 + $0x250] sm:$0xff]  }
 0xe30   : > { %v2237_v57 = vadd.f32 %v2236_v52, %v5449_v63  ;;  %v2280_v47 = vadd.f32 %v2279_v53, %v5452_v31  ;;  %v2238_v59 = vpop.f32.mrb[51].mxu0  ;;  %v2281_v60 = vpop.f32.mrb[51].mxu1  ;;  %v2296_v7 = vmax.f32 %v2233_v44, 0.0  ;;  %v2298_v9 = vmax.f32 %v2276_v45, 0.0  ;;  %v4795_v63 = vld [vmem:[%s5340_s24 + $0x170] sm:$0xff]   ;;  %v4810_v36 = vld [vmem:[%s5340_s24 + $0x288] sm:$0xff]  }
 0xe31   : > { %v2239_v61 = vadd.f32 %v2238_v59, %v1752_v24  ;;  %v2282_v0 = vadd.f32 %v2281_v60, %v1760_v28  ;;  %4400 = vmatpush3.bf16.msra.mxu0 %v4789_v43  ;;  %4422 = vmatpush3.bf16.msra.mxu1 %v4790_v56  ;;  %v4796_v31 = vld [vmem:[%s5340_s24 + $0x1f0] sm:$0xff]   ;;  %v2297_v14 = vmax.f32 %v2235_v54, 0.0  ;;  %v2299_v15 = vmax.f32 %v2278_v51, 0.0  ;;  %v4802_v28 = vld [vmem:[%s5340_s24 + $0x1b8] sm:$0xff]   ;;  %v4819_v43 = vld [vmem:[%s5340_s24 + $0x260] sm:$0xff]  }
 0xe32   : > { %v2312_v10 = vmax.f32 %v2237_v57, 0.0  ;;  %v2314_v12 = vmax.f32 %v2280_v47, 0.0  ;;  %4401 = vmatprep.subr.bf16.mxu0 %v4791_v49  ;;  %4423 = vmatprep.subr.bf16.mxu1 %v4792_v50  ;;  %v4797_v24 = vld [vmem:[%s5340_s24 + $0x130] sm:$0xff]   ;;  %v4816_v41 = vld [vmem:[%s5340_s24 + $0x2d8] sm:$0xff]   ;;  %v4820_v56 = vld [vmem:[%s5340_s24 + $0x2e0] sm:$0xff]  }
 0xe33   : > { %v2313_v17 = vmax.f32 %v2239_v61, 0.0  ;;  %v2315_v18 = vmax.f32 %v2282_v0, 0.0  ;;  %v4814_v38 = vld [vmem:[%s5340_s24 + $0x290] sm:$0xff]   ;;  %v4818_v42 = vld [vmem:[%s5340_s24 + $0x298] sm:$0xff]   ;;  %v4821_v44 = vld [vmem:[%s5340_s24 + $0x220] sm:$0xff]  }
 0xe34   : > { %v5522_v21 = vpack.c.bf16 %v2312_v10, %v2296_v7  ;;  %v5524_v23 = vpack.c.bf16 %v2314_v12, %v2298_v9  ;;  %v4822_v45 = vld [vmem:[%s5340_s24 + $0x2a0] sm:$0xff]   ;;  %v4823_v46 = vld [vmem:[%s5340_s24 + $0x268] sm:$0xff]   ;;  %v4827_v54 = vld [vmem:[%s5340_s24 + $0x270] sm:$0xff]  }
 0xe35   : > { %v5526_v8 = vpack.c.bf16 %v2313_v17, %v2297_v14  ;;  %v5528_v22 = vpack.c.bf16 %v2315_v18, %v2299_v15  ;;  %4402 = vmatpush3.bf16.msra.mxu0 %v4793_v3  ;;  %4424 = vmatpush3.bf16.msra.mxu1 %v4794_v6  ;;  %v4824_v48 = vld [vmem:[%s5340_s24 + $0x2e8] sm:$0xff]   ;;  %v4828_v51 = vld [vmem:[%s5340_s24 + $0x2f0] sm:$0xff]   ;;  %v4831_v57 = vld [vmem:[%s5340_s24 + $0x278] sm:$0xff]  }
 0xe36   : > { %4403 = vmatprep.subr.bf16.mxu0 %v4795_v63  ;;  %4425 = vmatprep.subr.bf16.mxu1 %v4796_v31  ;;  %v4825_v49 = vld [vmem:[%s5340_s24 + $0x228] sm:$0xff]   ;;  %v4829_v52 = vld [vmem:[%s5340_s24 + $0x230] sm:$0xff]   ;;  %v4832_v47 = vld [vmem:[%s5340_s24 + $0x2f8] sm:$0xff]  }
 0xe37   : > { %v4826_v50 = vld [vmem:[%s5340_s24 + $0x2a8] sm:$0xff]   ;;  %v4830_v53 = vld [vmem:[%s5340_s24 + $0x2b0] sm:$0xff]   ;;  %v4833_v59 = vld [vmem:[%s5340_s24 + $0x238] sm:$0xff]  }
 0xe38   : > { %v4834_v60 = vld [vmem:[%s5340_s24 + $0x2b8] sm:$0xff]   ;;  %v4835_v61 = vld [vmem:[%s5340_s24 + $0x340] sm:$0xff]   ;;  %v4839_v7 = vld [vmem:[%s5340_s24 + $0x348] sm:$0xff]  }
 0xe39   : > { %4404 = vmatpush3.bf16.msra.mxu0 %v4797_v24  ;;  %4426 = vmatpush3.bf16.msra.mxu1 %v4798_v25  ;;  %v4836_v0 = vld [vmem:[%s5340_s24 + $0x3c0] sm:$0xff]   ;;  %v4840_v9 = vld [vmem:[%s5340_s24 + $0x3c8] sm:$0xff]   ;;  %v4843_v63 = vld [vmem:[%s5340_s24 + $0x350] sm:$0xff]  }
 0xe3a   : > { %4405 = vmatprep.subr.bf16.mxu0 %v4799_v26  ;;  %4427 = vmatprep.subr.bf16.mxu1 %v4800_v27  ;;  %v4837_v3 = vld [vmem:[%s5340_s24 + $0x300] sm:$0xff]   ;;  %v4841_v10 = vld [vmem:[%s5340_s24 + $0x308] sm:$0xff]   ;;  %v4846_v31 = vld [vmem:[%s5340_s24 + $0x390] sm:$0xff]  }
 0xe3b   : > { %v4838_v6 = vld [vmem:[%s5340_s24 + $0x380] sm:$0xff]   ;;  %v4842_v12 = vld [vmem:[%s5340_s24 + $0x388] sm:$0xff]   ;;  %v4847_v14 = vld [vmem:[%s5340_s24 + $0x358] sm:$0xff]  }
 0xe3c   : > { %v4848_v15 = vld [vmem:[%s5340_s24 + $0x3d8] sm:$0xff]   ;;  %v4853_v24 = vld [vmem:[%s5340_s24 + $0x320] sm:$0xff]   ;;  %v4855_v26 = vld [vmem:[%s5340_s24 + $0x368] sm:$0xff]  }
 0xe3d   : > { %4406 = vmatpush3.bf16.msra.mxu0 %v4801_v29  ;;  %4428 = vmatpush3.bf16.msra.mxu1 %v4802_v28  ;;  %v4849_v17 = vld [vmem:[%s5340_s24 + $0x318] sm:$0xff]   ;;  %v4854_v25 = vld [vmem:[%s5340_s24 + $0x3a0] sm:$0xff]   ;;  %v4856_v27 = vld [vmem:[%s5340_s24 + $0x3e8] sm:$0xff]  }
 0xe3e   : > { %4435 = vmatprep.subr.bf16.mxu0 %v4803_v13  ;;  %4457 = vmatprep.subr.bf16.mxu1 %v4804_v30  ;;  %v4850_v18 = vld [vmem:[%s5340_s24 + $0x398] sm:$0xff]   ;;  %v4857_v29 = vld [vmem:[%s5340_s24 + $0x328] sm:$0xff]   ;;  %v4859_v13 = vld [vmem:[%s5340_s24 + $0x370] sm:$0xff]  }
 0xe3f   : > { %v4858_v28 = vld [vmem:[%s5340_s24 + $0x3a8] sm:$0xff]   ;;  %v4860_v30 = vld [vmem:[%s5340_s24 + $0x3f0] sm:$0xff]  }
 0xe40   : > { %3478 = vmatmul.mubr.bf16.vlgmr.msra.gmra.mrb[56].mxu0 %v5485_v55  ;;  %3519 = vmatmul.mubr.bf16.vlgmr.msra.gmra.mrb[56].mxu1 %v5487_v2  ;;  %v4812_v55 = vld [vmem:[%s5340_s24 + $0x2d0] sm:$0xff]  }
 0xe41   : > { %4436 = vmatpush3.bf16.msra.mxu0 %v4805_v58  ;;  %3559 = vmatprep.mubr.bf16.mxu0 %v5506_v62  ;;  %v4813_v2 = vld [vmem:[%s5340_s24 + $0x210] sm:$0xff]   ;;  %v4815_v62 = vld [vmem:[%s5340_s24 + $0x258] sm:$0xff]  }
 0xe42   : > { %4458 = vmatpush3.bf16.msra.mxu1 %v4806_v5  ;;  %3600 = vmatprep.mubr.bf16.mxu1 %v5508_v40  ;;  %v4817_v40 = vld [vmem:[%s5340_s24 + $0x218] sm:$0xff]   ;;  %v4861_v58 = vld [vmem:[%s5340_s24 + $0x330] sm:$0xff]  }
 0xe43   : > { %4437 = vmatprep.subr.bf16.mxu0 %v4807_v32  ;;  %4459 = vmatprep.subr.bf16.mxu1 %v4808_v34  ;;  %v4862_v5 = vld [vmem:[%s5340_s24 + $0x3b0] sm:$0xff]   ;;  %v4863_v32 = vld [vmem:[%s5340_s24 + $0x378] sm:$0xff]  }
 0xe44   : > { %v4864_v34 = vld [vmem:[%s5340_s24 + $0x3f8] sm:$0xff]  }
 0xe45   : > { %4438 = vmatpush3.bf16.msra.mxu0 %v4809_v35  ;;  %v4865_v35 = vld [vmem:[%s5340_s24 + $0x338] sm:$0xff]  }
 0xe46   : > { %4460 = vmatpush3.bf16.msra.mxu1 %v4810_v36  ;;  %4439 = vmatprep.subr.bf16.mxu0 %v4811_v37  ;;  %v4866_v36 = vld [vmem:[%s5340_s24 + $0x3b8] sm:$0xff]  }
 0xe47   : > { %4461 = vmatprep.subr.bf16.mxu1 %v4812_v55 }
 0xe49   : > { %4440 = vmatpush3.bf16.msra.mxu0 %v4813_v2  ;;  %v5611_v2 = vld [vmem:[%s5296_s25] sm:$0x3f] }
 0xe4a   : > { %4462 = vmatpush3.bf16.msra.mxu1 %v4814_v38  ;;  %4441 = vmatprep.subr.bf16.mxu0 %v4815_v62  ;;  %v2594_v38 = vrot.slane %v5611_v2, %v5455_v33 }
 0xe4b   : > { %4463 = vmatprep.subr.bf16.mxu1 %v4816_v41 }
 0xe4d   : > { %4442 = vmatpush3.bf16.msra.mxu0 %v4817_v40 }
 0xe4e   : > { %4464 = vmatpush3.bf16.msra.mxu1 %v4818_v42  ;;  %4443 = vmatprep.subr.bf16.mxu0 %v4819_v43 }
 0xe4f   : > { %4465 = vmatprep.subr.bf16.mxu1 %v4820_v56 }
 0xe51   : > { %4444 = vmatpush3.bf16.msra.mxu0 %v4821_v44 }
 0xe52   : > { %4466 = vmatpush3.bf16.msra.mxu1 %v4822_v45  ;;  %4445 = vmatprep.subr.bf16.mxu0 %v4823_v46 }
 0xe53   : > { %4467 = vmatprep.subr.bf16.mxu1 %v4824_v48 }
 0xe55   : > { %4446 = vmatpush3.bf16.msra.mxu0 %v4825_v49 }
 0xe56   : > { %4468 = vmatpush3.bf16.msra.mxu1 %v4826_v50  ;;  %4447 = vmatprep.subr.bf16.mxu0 %v4827_v54 }
 0xe57   : > { %4469 = vmatprep.subr.bf16.mxu1 %v4828_v51 }
 0xe59   : > { %4448 = vmatpush3.bf16.msra.mxu0 %v4829_v52 }
 0xe5a   : > { %4470 = vmatpush3.bf16.msra.mxu1 %v4830_v53  ;;  %4449 = vmatprep.subr.bf16.mxu0 %v4831_v57 }
 0xe5b   : > { %4471 = vmatprep.subr.bf16.mxu1 %v4832_v47 }
 0xe5d   : > { %4450 = vmatpush3.bf16.msra.mxu0 %v4833_v59 }
 0xe5e   : > { %4472 = vmatpush3.bf16.msra.mxu1 %v4834_v60  ;;  %4479 = vmatprep.subr.bf16.mxu0 %v4835_v61 }
 0xe5f   : > { %4501 = vmatprep.subr.bf16.mxu1 %v4836_v0 }
 0xe60   : > { %3560 = vmatmul.mubr.bf16.vlgmr.msra.gmra.mrb[60].mxu0 %v5502_v1  ;;  %v4844_v1 = vld [vmem:[%s5340_s24 + $0x3d0] sm:$0xff]  }
 0xe61   : > { %3601 = vmatmul.mubr.bf16.vlgmr.msra.gmra.mrb[60].mxu1 %v5504_v39  ;;  %4480 = vmatpush3.bf16.msra.mxu0 %v4837_v3  ;;  %v4845_v39 = vld [vmem:[%s5340_s24 + $0x310] sm:$0xff]  }
 0xe62   : > { %3641 = vmatprep.mubr.bf16.mxu0 %v5526_v8  ;;  %4502 = vmatpush3.bf16.msra.mxu1 %v4838_v6  ;;  %v4851_v8 = vld [vmem:[%s5340_s24 + $0x360] sm:$0xff]  }
 0xe63   : > { %3682 = vmatprep.mubr.bf16.mxu1 %v5528_v22  ;;  %4481 = vmatprep.subr.bf16.mxu0 %v4839_v7  ;;  %v4852_v22 = vld [vmem:[%s5340_s24 + $0x3e0] sm:$0xff]  }
 0xe64   : > { %4503 = vmatprep.subr.bf16.mxu1 %v4840_v9 }
 0xe65   : > { %4482 = vmatpush3.bf16.msra.mxu0 %v4841_v10 }
 0xe66   : > { %4504 = vmatpush3.bf16.msra.mxu1 %v4842_v12  ;;  %4483 = vmatprep.subr.bf16.mxu0 %v4843_v63 }
 0xe67   : > { %4505 = vmatprep.subr.bf16.mxu1 %v4844_v1 }
 0xe69   : > { %4484 = vmatpush3.bf16.msra.mxu0 %v4845_v39 }
 0xe6a   : > { %4506 = vmatpush3.bf16.msra.mxu1 %v4846_v31  ;;  %4485 = vmatprep.subr.bf16.mxu0 %v4847_v14 }
 0xe6b   : > { %4507 = vmatprep.subr.bf16.mxu1 %v4848_v15 }
 0xe6d   : > { %4486 = vmatpush3.bf16.msra.mxu0 %v4849_v17 }
 0xe6e   : > { %4508 = vmatpush3.bf16.msra.mxu1 %v4850_v18  ;;  %4487 = vmatprep.subr.bf16.mxu0 %v4851_v8 }
 0xe6f   : > { %4509 = vmatprep.subr.bf16.mxu1 %v4852_v22 }
 0xe71   : > { %4488 = vmatpush3.bf16.msra.mxu0 %v4853_v24 }
 0xe72   : > { %4510 = vmatpush3.bf16.msra.mxu1 %v4854_v25  ;;  %4489 = vmatprep.subr.bf16.mxu0 %v4855_v26 }
 0xe73   : > { %4511 = vmatprep.subr.bf16.mxu1 %v4856_v27 }
 0xe75   : > { %4490 = vmatpush3.bf16.msra.mxu0 %v4857_v29 }
 0xe76   : > { %4512 = vmatpush3.bf16.msra.mxu1 %v4858_v28  ;;  %4491 = vmatprep.subr.bf16.mxu0 %v4859_v13 }
 0xe77   : > { %4513 = vmatprep.subr.bf16.mxu1 %v4860_v30 }
 0xe79   : > { %4492 = vmatpush3.bf16.msra.mxu0 %v4861_v58 }
 0xe7a   : > { %4514 = vmatpush3.bf16.msra.mxu1 %v4862_v5  ;;  %4493 = vmatprep.subr.bf16.mxu0 %v4863_v32 }
 0xe7b   : > { %4515 = vmatprep.subr.bf16.mxu1 %v4864_v34 }
 0xe7d   : > { %4494 = vmatpush3.bf16.msra.mxu0 %v4865_v35 }
 0xe7e   : > { %4516 = vmatpush3.bf16.msra.mxu1 %v4866_v36 }
 0xe80   : > { %3642 = vmatmul.mubr.bf16.vlgmr.msra.gmra.mrb[64].mxu0 %v5522_v21 }
 0xe81   : > { %3683 = vmatmul.mubr.bf16.vlgmr.msra.gmra.mrb[64].mxu1 %v5524_v23 }
 0xef3   : > { %v4363_v37 = vpop.f32.mrb[52].mxu0  ;;  %v4385_v55 = vpop.f32.mrb[52].mxu1 }
 0xef4   : > { %v4364_v62 = vpop.f32.mrb[53].mxu0  ;;  %v4386_v41 = vpop.f32.mrb[53].mxu1 }
 0xef5   : > { %v4365_v40 = vadd.f32 %v4364_v62, %v4363_v37  ;;  %v4387_v42 = vadd.f32 %v4386_v41, %v4385_v55  ;;  %v4366_v43 = vpop.f32.mrb[54].mxu0  ;;  %v4388_v56 = vpop.f32.mrb[54].mxu1 }
 0xef6   : > { %v4367_v44 = vpop.f32.mrb[55].mxu0  ;;  %v4389_v45 = vpop.f32.mrb[55].mxu1 }
 0xef7   : > { %v3398_v46 = vadd.f32 %v4365_v40, %v2594_v38  ;;  %v4368_v48 = vadd.f32 %v4367_v44, %v4366_v43  ;;  %v4390_v21 = vadd.f32 %v4389_v45, %v4388_v56 }
 0xef9   : > { %v3439_v49 = vadd.f32 %v4387_v42, %v3398_v46  ;;  %v3401_v23 = vadd.f32 %v4368_v48, %v2594_v38 }
 0xefb   : > { %v3442_v50 = vadd.f32 %v4390_v21, %v3401_v23 }
 0xf13   : > { %v4407_v54 = vpop.f32.mrb[56].mxu0  ;;  %v4429_v51 = vpop.f32.mrb[56].mxu1 }
 0xf14   : > { %v4408_v52 = vpop.f32.mrb[57].mxu0  ;;  %v4430_v53 = vpop.f32.mrb[57].mxu1 }
 0xf15   : > { %v4409_v57 = vadd.f32 %v4408_v52, %v4407_v54  ;;  %v4431_v33 = vadd.f32 %v4430_v53, %v4429_v51  ;;  %v4410_v47 = vpop.f32.mrb[58].mxu0  ;;  %v4432_v59 = vpop.f32.mrb[58].mxu1 }
 0xf16   : > { %v4411_v60 = vpop.f32.mrb[59].mxu0  ;;  %v4433_v61 = vpop.f32.mrb[59].mxu1 }
 0xf17   : > { %v3480_v0 = vadd.f32 %v4409_v57, %v3439_v49  ;;  %v4412_v3 = vadd.f32 %v4411_v60, %v4410_v47  ;;  %v4434_v6 = vadd.f32 %v4433_v61, %v4432_v59  ;;  %v3722_v60 = vrot.slane %v5611_v2, %v5442_v4  ;;  %v4909_v4 = vld [vmem:[%s5714_s10 + $0x10] sm:$0xff] (!%p4280_p5)  }
 0xf19   : > { %v3521_v7 = vadd.f32 %v4431_v33, %v3480_v0  ;;  %v3483_v9 = vadd.f32 %v4412_v3, %v3442_v50  ;;  %v3728_v0 = vrot.slane %v5611_v2, %v5462_v16  ;;  %v4910_v16 = vld [vmem:[%s5714_s10] sm:$0xff] (!%p4280_p5)   ;;  %v4911_v2 = vld [vmem:[%s5714_s10 + $0x18] sm:$0xff] (!%p4280_p5)  }
 0xf1b   : > { %v3524_v10 = vadd.f32 %v4434_v6, %v3483_v9 }
 0xf33   : > { %v4451_v12 = vpop.f32.mrb[60].mxu0 }
 0xf34   : > { %v4473_v63 = vpop.f32.mrb[60].mxu1  ;;  %v4452_v1 = vpop.f32.mrb[61].mxu0 }
 0xf35   : > { %v4453_v39 = vadd.f32 %v4452_v1, %v4451_v12  ;;  %v4474_v31 = vpop.f32.mrb[61].mxu1  ;;  %v4454_v14 = vpop.f32.mrb[62].mxu0  ;;  %v4986_v1 = vmov (!%p4280_p5), 0.0  }
 0xf36   : > { %v4475_v15 = vadd.f32 %v4474_v31, %v4473_v63  ;;  %v4476_v17 = vpop.f32.mrb[62].mxu1  ;;  %v4455_v18 = vpop.f32.mrb[63].mxu0  ;;  %4644 = vmatprep.subr.bf16.mxu0 (!%p4280_p5), %v4986_v1  ;;  %4652 = vmatprep.subr.bf16.mxu1 (!%p4280_p5), %v4986_v1  ;;  %v4912_v31 = vld [vmem:[%s5714_s10 + $0x8] sm:$0xff] (!%p4280_p5)  }
 0xf37   : > { %v3562_v8 = vadd.f32 %v4453_v39, %v3521_v7  ;;  %v4456_v22 = vadd.f32 %v4455_v18, %v4454_v14  ;;  %v4477_v24 = vpop.f32.mrb[63].mxu1  ;;  %4645 = vmatpush3.bf16.msra.mxu0 (!%p4280_p5), %v4909_v4  ;;  %4648 = vmatprep.mubr.msk.bf16.mxu0 (!%p4280_p5), %vm4987_vm7, %v4986_v1 }
 0xf38   : > { %v4478_v25 = vadd.f32 %v4477_v24, %v4476_v17  ;;  %4653 = vmatpush3.bf16.msra.mxu1 (!%p4280_p5), %v4910_v16  ;;  %4646 = vmatprep.subr.bf16.mxu0 (!%p4280_p5), %v4986_v1  ;;  %v3948_v24 = vld [vmem:[%s5706_s2] sm:$0xff] (!%p4280_p5) }
 0xf39   : > { %v3603_v26 = vadd.f32 %v4475_v15, %v3562_v8  ;;  %v3565_v27 = vadd.f32 %v4456_v22, %v3524_v10  ;;  %4654 = vmatprep.subr.bf16.mxu1 (!%p4280_p5), %v4986_v1  ;;  %4656 = vmatprep.mubr.msk.bf16.mxu1 (!%p4280_p5), %vm4987_vm7, %v4986_v1  ;;  %v4913_v22 = vld [vmem:[%s5716_s12] sm:$0xff] (!%p4280_p5)  }
 0xf3b   : > { %v3606_v29 = vadd.f32 %v4478_v25, %v3565_v27  ;;  %4647 = vmatpush3.bf16.msra.mxu0 (!%p4280_p5), %v4911_v2  ;;  %v4988_v25 = vmov (!%p4280_p5), 0  }
 0xf3c   : > { %4655 = vmatpush3.bf16.msra.mxu1 (!%p4280_p5), %v4912_v31  ;;  %4660 = vmatprep.subr.bf16.mxu0 (!%p4280_p5), %v4986_v1 }
 0xf3d   : > { %4908 = vset.pattern.permute.xlu0 (!%p4280_p5), %v4988_v25 }
 0xf53   : > { %v4495_v28 = vpop.f32.mrb[64].mxu0 }
 0xf54   : > { %v4517_v13 = vpop.f32.mrb[64].mxu1  ;;  %v4496_v30 = vpop.f32.mrb[65].mxu0 }
 0xf55   : > { %v4497_v58 = vadd.f32 %v4496_v30, %v4495_v28  ;;  %v4518_v5 = vpop.f32.mrb[65].mxu1  ;;  %v4498_v32 = vpop.f32.mrb[66].mxu0  ;;  %v4291_v28 = vld [vmem:[%s5715_s11] ss:$0 sm:$0xff] (!%p4280_p5) }
 0xf56   : > { %v4519_v34 = vadd.f32 %v4518_v5, %v4517_v13  ;;  %v4520_v35 = vpop.f32.mrb[66].mxu1  ;;  %v4499_v36 = vpop.f32.mrb[67].mxu0 }
 0xf57   : > { %v3644_v37 = vadd.f32 %v4497_v58, %v3603_v26  ;;  %v4500_v55 = vadd.f32 %v4499_v36, %v4498_v32  ;;  %v4521_v38 = vpop.f32.mrb[67].mxu1  ;;  %v3949_v26 = vld [vmem:[%s5706_s2 + $0x8] sm:$0xff] (!%p4280_p5) }
 0xf58   : > { %v4522_v62 = vadd.f32 %v4521_v38, %v4520_v35 }
 0xf59   : > { %v3685_v41 = vadd.f32 %v4519_v34, %v3644_v37  ;;  %v3647_v40 = vadd.f32 %v4500_v55, %v3606_v29 }
 0xf5b   : > { %v3688_v42 = vadd.f32 %v4522_v62, %v3647_v40  ;;  %v3691_v43 = vadd.f32 %v3685_v41, %v5357_v19  ;;  %v4292_v40 = vld [vmem:[%s5717_s13] ss:$0 sm:$0xff] (!%p4280_p5) }
 0xf5d   : > { %v3693_v56 = vsel %vm560_vm2, %v3691_v43, 0.0  ;;  %v3692_v44 = vadd.f32 %v3688_v42, %v5359_v20 }
 0xf5e   : > { %3694 = vadd.xlane.f32.xlu0 %v3693_v56 }
 0xf5f   : > { %v3696_v45 = vsel %vm560_vm2, %v3692_v44, 0.0 }
 0xf60   : > { %3697 = vadd.xlane.f32.xlu1 %v3696_v45 }
 0xfeb   : > { %v3695_v46 = vpop.xlane.xlu0 %3694 }
 0xfec   : > { %v3699_v48 = vmul.f32 0.03125, %v3695_v46 }
 0xfed   : > { %v3698_v21 = vpop.xlane.xlu1 %3697 }
 0xfee   : > { %v3701_v49 = vsub.f32 %v3691_v43, %v3699_v48  ;;  %v3700_v23 = vmul.f32 0.03125, %v3698_v21 }
 0xff0   : > { %v3702_v50 = vsub.f32 %v3692_v44, %v3700_v23  ;;  %v3703_v54 = vmul.f32 %v3701_v49, %v3701_v49 }
 0xff2   : > { %v3705_v51 = vsel %vm560_vm2, %v3703_v54, 0.0  ;;  %v3704_v52 = vmul.f32 %v3702_v50, %v3702_v50 }
 0xff3   : > { %3706 = vadd.xlane.f32.xlu0 %v3705_v51 }
 0xff4   : > { %v3708_v19 = vsel %vm560_vm2, %v3704_v52, 0.0 }
 0xff5   : > { %3709 = vadd.xlane.f32.xlu1 %v3708_v19 }
0x1009   : > { %3952 = vperm.xlu0 (!%p4280_p5), %4908, %v3948_v24  }
0x100d   : > { %3957 = vperm.xlu0 (!%p4280_p5), %4908, %v3949_v26  }
0x1080   : > { %v3707_v53 = vpop.xlane.xlu0 %3706 }
0x1081   : > { %v3711_v20 = vmul.f32 0.03125, %v3707_v53 }
0x1082   : > { %v3710_v57 = vpop.xlane.xlu1 %3709 }
0x1083   : > { %v3713_v33 = vadd.f32 1e-05, %v3711_v20  ;;  %v3712_v47 = vmul.f32 0.03125, %v3710_v57 }
0x1085   : > { %4903 = vrsqrt.f32 %v3713_v33  ;;  %v3714_v59 = vadd.f32 1e-05, %v3712_v47 }
0x1087   : > { %4905 = vrsqrt.f32 %v3714_v59 }
0x1088   : > { %v3953_v42 = vpop.permute.xlu0 (!%p4280_p5), %3952 }
0x108c   : > { %v3958_v23 = vpop.permute.xlu0 (!%p4280_p5), %3957 }
0x108f   : > { %v4904_v61 = vpop.eup %4903 }
0x1090   : > { %v3717_v3 = vmul.f32 %v4904_v61, %v3701_v49 }
0x1091   : > { %v4906_v6 = vpop.eup %4905 }
0x1092   : > { %v3723_v7 = vmul.f32 %v3722_v60, %v3717_v3  ;;  %v3718_v9 = vmul.f32 %v4906_v6, %v3702_v50  ;;  %3736 = sbr.rel (%p4280_p5) target bundleno = 4698 (0x125a), region = 84 }
0x1094   : > { %v3729_v10 = vadd.f32 %v3728_v0, %v3723_v7  ;;  %v3724_v12 = vmul.f32 %v3722_v60, %v3718_v9 }
0x1096   : > { %3731 = vst.msk [vmem:[#allocation2] sm:$0xff] %vm560_vm2, %v3729_v10  ;;  %v3730_v63 = vadd.f32 %v3728_v0, %v3724_v12  ;;  %v3738_v39 = vrot.slane (!%p4280_p5), %v3729_v10, 1 }
0x1098   : > { %3732 = vst.msk [vmem:[#allocation2 + $0x8] sm:$0xff] %vm560_vm2, %v3730_v63  ;;  %v3739_v14 = vrot.slane (!%p4280_p5), %v3730_v63, 1  ;;  %v3737_v8 = vpack.c.bf16 (!%p4280_p5), %v3730_v63, %v3729_v10 }
0x109a   : > { %v3743_v15 = vsel %vm3742_vm8, %v3738_v39, %v3739_v14  ;;  %v3744_v17 = vsel %vm3742_vm8, %v3739_v14, %v3738_v39  ;;  %4657 = vmatmul.mubr.msk.bf16.vlgmr.msra.gmra.mrb[0].mxu1 %vm560_vm2, %v3737_v8 }
0x109b   : > { %v3745_v18 = vpack.c.bf16 %v3744_v17, %v3743_v15 }
0x109d   : > { %4649 = vmatmul.mubr.msk.bf16.vlgmr.msra.gmra.mrb[0].mxu0 %vm560_vm2, %v3745_v18 }
0x109e   : > { %4664 = vmatprep.mubr.msk.bf16.mxu0 %vm4987_vm7, %v4986_v1  ;;  %4661 = vmatpush3.bf16.msra.mxu0 %v4913_v22 }
0x109f   : > { %4662 = vmatprep.subr.bf16.mxu0 %v4986_v1 }
0x10a2   : > { %4663 = vmatpush3.bf16.msra.mxu0 %v4914_v11 }
0x116d   : > { %v3860_v29 = vpop.f32.mrb[0].mxu1 }
0x116e   : > { %v4658_v58 = vpop.f32.mrb[1].mxu1 }
0x116f   : > { %v3863_v32 = vpop.f32.mrb[2].mxu1 }
0x1170   : > { %v3804_v27 = vpop.f32.mrb[0].mxu0  ;;  %v4659_v37 = vpop.f32.mrb[3].mxu1 }
0x1171   : > { %v4650_v13 = vpop.f32.mrb[1].mxu0  ;;  %v3861_v30 = vadd.f32 %v3860_v29, %v3804_v27 }
0x1172   : > { %v3807_v5 = vpop.f32.mrb[2].mxu0 }
0x1173   : > { %v4651_v34 = vpop.f32.mrb[3].mxu0  ;;  %v3874_v35 = vadd.f32 %v4291_v28, %v3861_v30  ;;  %v3864_v36 = vadd.f32 %v3863_v32, %v3807_v5 }
0x1175   : > { %v3875_v55 = vadd.f32 %v4291_v28, %v3864_v36  ;;  %v3876_v38 = vmax.f32 %v3874_v35, 0.0 }
0x1177   : > { %v3877_v62 = vmax.f32 %v3875_v55, 0.0 }
0x1179   : > { %v3878_v41 = vpack.c.bf16 %v3877_v62, %v3876_v38 }
0x117b   : > { %4665 = vmatmul.mubr.msk.bf16.vlgmr.msra.gmra.mrb[4].mxu0 %vm560_vm2, %v3878_v41 }
0x124e   : > { %v3939_v43 = vpop.f32.mrb[4].mxu0 }
0x124f   : > { %v3940_v56 = vadd.f32 %v4292_v40, %v3939_v43  ;;  %v4666_v44 = vpop.f32.mrb[5].mxu0 }
0x1250   : > { %v3942_v45 = vpop.f32.mrb[6].mxu0 }
0x1251   : > { %v3946_v46 = vmax.f32 %v3940_v56, 0.0  ;;  %v3943_v48 = vadd.f32 %v4292_v40, %v3942_v45  ;;  %v4667_v21 = vpop.f32.mrb[7].mxu0 }
0x1253   : > { %v3947_v49 = vmax.f32 %v3943_v48, 0.0  ;;  %v3960_v50 = vmul.f32 %v3953_v42, %v3946_v46 }
0x1255   : > { %v3961_v54 = vmul.f32 %v3958_v23, %v3947_v49 }
0x1257   : > { %v4307_v51 = vpack.c.bf16 %v3961_v54, %v3960_v50 }
0x1259   : > { %4308 = vst [vmem:[#allocation3] sm:$0xff] %v4307_v51  }
0x125a PF: > { %p5667_p6 = scmp.eq.s32.totalorder %s4071_s16, 1  ;;  %s4989_s19 = smov [#allocation3]  }
0x125b   : > { %s3975_s22 = sshll.u32 %s4989_s19, 4  ;;  %s3976_s22 = int_to_ptr.vmem [resolvable:$true] %s3975_s22 }
0x125c   : > { %s4915_s25 = scalar_lea.vmem %s3976_s22, 128  ;;  %p4922_p10 = scmp.lt.s32.totalorder %s3976_s22, %s3976_s22 }
0x125d   : > { %p4916_p7 = scmp.ne.s32.totalorder %s3976_s22, %s4915_s25  ;;  %p4923_p11 = scmp.lt.s32.totalorder %s4915_s25, %s4915_s25 }
0x125f   : > { %p4917_p8 = pnand %p4916_p7, %p5667_p6  ;;  %p4924_p12 = por %p4923_p11, %p4922_p10 }
0x1261   : > { %p4918_p9 = pneg %p4917_p8 }
0x1263   : > { %p4925_p13 = pnand %p4924_p12, %p4918_p9 }
0x1265   : > { %4928 = shalt.err (!%p4925_p13)
}
0x1266   : > { %s4929_s16 = scalar_lea.hbm %s5718_s14, 128 }
0x1267   : > { %p4930_p0 = scmp.ne.s32.totalorder %s5718_s14, %s4929_s16  ;;  %p4935_p3 = scmp.lt.u32.totalorder %s4929_s16, %s5718_s14 }
0x1269   : > { %p4931_p1 = pnand %p4930_p0, %p5667_p6 }
0x126b   : > { %p4932_p2 = pneg %p4931_p1 }
0x126d   : > { %p4937_p4 = pnand %p4935_p3, %p4932_p2 }
0x126f   : > { %4940 = shalt.err (!%p4937_p4)
}
0x1270   : > { %s4990_s26 = smov 4  }
0x1271   : > { %4669 = dma.vmem_to_hbm [thread:$0]  (%p5667_p6), %s3976_s22, 128, %s5718_s14, [#allocation4], %s4972_s27, %s4972_s27, %s4990_s26  }
0x1272   : > { %4954 = dma.done.wait (%p5667_p6), [#allocation4], 128  }
0x1273   : > { %4956 = vsyncadd (%p5667_p6), [#allocation4], 4294967168 }
0x1274 PF: > { %s25_s15 = sadd.s32 1, %s4967_s15   ;;  %s5720_s29 = smov %s4963_s30 }
0x1275   : > { %p22_p5 = scmp.ge.s32.totalorder %s25_s15, 4   ;;  %s5721_s30 = smov %s5723_s17 }
0x1277   :  { %24 = sbr.rel (!%p22_p5) target bundleno = 2 (0x2), region = 126 }
0x127e   :  { %3991 = vsyncpa [#allocation4], 1 }
0x127f   :  { %3993 = vsyncpa [#allocation4 + $0x1], 1 }

</bundles_post_ra>
